<compile_context>
chip_gen: v5e
topology: v5e:2x2
jax: 0.10.0
libtpu: 0.0.40
codegen_flags: <defaults>
</compile_context>

<pallas_src>
import functools

import jax
import jax.numpy as jnp
from jax import lax
from jax.experimental import pallas as pl
from jax.experimental.pallas import tpu as pltpu


def _cdiv(a, b):
    return (a + b - 1) // b


def _eegcnn_kernel(x_ref, w1_ref, b1_ref, w2_ref, b2_ref, wsel_ref, o_ref, *,
                   cin, c1, c2, k_taps, pool):
    # x_ref: (Cin, B_TILE, W) VMEM block, channel-major so x_ref[c] is (B_TILE, W)
    # with the (possibly padded) sequence dim on the 128-wide lane axis.
    W = x_ref.shape[-1]
    curr = W - k_taps + 1          # conv2 "valid" output length
    L = curr - pool + 1            # rolling-max length

    # Hoist input loads + casts out of the output-channel loop: one VMEM read
    # per input channel per grid step (was c1*cin reads; Mosaic does not
    # reliably CSE repeated ref reads).
    xs = [x_ref[c].astype(jnp.float32) for c in range(cin)]

    # conv2 accumulators, one (B_TILE, curr) slab per output channel,
    # initialized from the first tap (no zero fill).
    acc2 = [None] * c2

    for ic1 in range(c1):
        # ---- conv1 (1x1, no bias), BN1 scale pre-folded into w1: VPU FMA ----
        a = w1_ref[ic1 * cin + 0] * xs[0]
        for ic in range(1, cin):
            a = a + w1_ref[ic1 * cin + ic] * xs[ic]
        # BN1 shift + tanh (EUP)
        h1 = jnp.tanh(a + b1_ref[ic1])                         # (B_TILE, W)

        # ---- conv2 (1, K) "valid", no bias, BN2 scale pre-folded into w2:
        #      one lane-offset slice per tap, reused across all C2 outputs ----
        for kk in range(k_taps):
            sl = h1[:, kk:kk + curr]                           # (B_TILE, curr)
            for oc in range(c2):
                wt = w2_ref[(oc * c1 + ic1) * k_taps + kk]
                term = wt * sl
                acc2[oc] = term if acc2[oc] is None else acc2[oc] + term

    out = None
    for oc in range(c2):
        # BN2 shift + tanh
        h2 = jnp.tanh(acc2[oc] + b2_ref[oc])                   # (B_TILE, curr)
        # MaxPool(pool, stride=pool) as a rolling max over contiguous offset
        # slices; the stride-`pool` decimation (and any sequence padding) is
        # folded into wsel (zeros at unused positions), so no strided slices,
        # lane reshapes or in-kernel masking are needed.
        rm = h2[:, 0:L]
        for p in range(1, pool):
            rm = jnp.maximum(rm, h2[:, p:p + L])
        # TODO(synk): training-mode dropout (RNG mask + 1/(1-p) scale) not
        # implemented; eval-mode dropout is identity.
        contrib = jnp.dot(rm, wsel_ref[oc],
                          preferred_element_type=jnp.float32,
                          precision=lax.Precision.HIGHEST)
        out = contrib if out is None else out + contrib
    o_ref[...] = out.astype(o_ref.dtype)


def _tpu_generation():
    """Best-effort (tensorcores_per_device, vmem_limit_bytes)."""
    try:
        kind = jax.devices()[0].device_kind.lower()
    except Exception:
        kind = ""
    if "v7" in kind:
        # v7x: 2 TensorCores sharing 64 MiB physical VMEM -> keep headroom.
        return 2, 48 * 1024 * 1024
    if "v4" in kind or "v5p" in kind:
        # Megacore parts: 2 TensorCores, 128 MiB VMEM.
        return 2, 64 * 1024 * 1024
    # v5e / v6e: single TensorCore, 128 MiB physical VMEM.
    return 1, 64 * 1024 * 1024


def _pick_b_tile(B, cin, c2, W, curr, *, num_cores=1,
                 dma_budget_bytes=8 * 1024 * 1024, max_vregs=48):
    """Pick a batch tile (multiple of 8 dividing B) that
      (a) keeps the double-buffered input block under `dma_budget_bytes`, and
      (b) keeps the live vreg working set -- cin input slabs of (bt, W) plus
          (c2+2) conv2/h1 slabs of (bt, curr) in f32 -- comfortably under the
          64-vreg file so accumulators never spill to VMEM.
    On single-TC parts returns the largest such tile (fewest grid steps, each
    step costs ~0.35us fixed overhead); on multi-TC parts prefers a tile whose
    grid length is a multiple of num_cores so no core idles."""
    if B % 8 != 0:
        return B                                  # block dim == full array dim

    def fits(bt):
        dma = 2 * cin * bt * W * 4                # double-buffered x block
        vregs = (bt // 8) * (cin * _cdiv(W, 128) + (c2 + 2) * _cdiv(curr, 128))
        return dma <= dma_budget_bytes and vregs <= max_vregs

    cands = [d for d in range(8, B + 1, 8) if B % d == 0 and fits(d)]
    if not cands:
        return 8
    if num_cores > 1:
        multi = [d for d in cands
                 if (B // d) >= num_cores and (B // d) % num_cores == 0]
        if multi:
            return max(multi)
    return max(cands)


def eegcnn_light_forward(x_nchw, params, *, pool, b_tile=None):
    """Full EEGCNNLight forward (inference mode) in one Pallas TPU kernel."""
    w1, s1, b1, w2, s2, b2, wfc = params
    B, Cin, H, W = x_nchw.shape
    assert H == 1, "EEGCNNLight's fc sizing implies the spatial H dim is 1"
    C1 = w1.shape[0]
    C2, _, K = w2.shape
    curr = W - K + 1
    # torch MaxPool2d floors while the module sizes fc with round(curr/pool);
    # both agree (and the kernel is valid) only when pool divides curr.
    assert curr % pool == 0, (
        f"(seq_len - kernel_size + 1) = {curr} must be divisible by "
        f"maxpool_size = {pool} for EEGCNNLight's fc sizing to be consistent")
    Wp = curr // pool
    num_classes = wfc.shape[0]

    # ---- plain-JAX glue (constant folding, runs once outside the hot path) ---
    # Zero-pad the sequence axis up to a lane multiple when it exceeds one vreg
    # row; the zero-expanded FC weight gives padded positions zero weight, so
    # no in-kernel masking is needed.  (For W <= 128 padding buys nothing: the
    # slab already fits a single, partially-masked vreg row.)
    W_pad = W if W <= 128 else _cdiv(W, 128) * 128
    curr_pad = W_pad - K + 1
    L_pad = curr_pad - pool + 1

    # channel-major, lane-dense input: (Cin, B, W_pad)
    x_cbw = jnp.transpose(x_nchw.reshape(B, Cin, W), (1, 0, 2))
    if W_pad != W:
        x_cbw = jnp.pad(x_cbw, ((0, 0), (0, 0), (0, W_pad - W)))

    # Fold the inference BatchNorm scales into the conv weights (constant-into-
    # constant folding); only the per-channel shifts remain as in-kernel adds.
    w1f = (w1 * s1[:, None]).reshape(C1 * Cin).astype(jnp.float32)
    w2f = (w2 * s2[:, None, None]).reshape(C2 * C1 * K).astype(jnp.float32)
    b1f = b1.astype(jnp.float32)
    b2f = b2.astype(jnp.float32)

    # FC weight: undo torch flatten order (c2*Wp + wp), pre-transpose, and fold
    # the stride-`pool` decimation of the in-kernel rolling max (plus any seq
    # padding) into a zero-expanded (C2, L_pad, num_classes) weight.
    wfc_r = wfc.reshape(num_classes, C2, Wp).transpose(1, 2, 0)     # (C2,Wp,nc)
    wsel = jnp.zeros((C2, L_pad, num_classes), jnp.float32)
    wsel = wsel.at[:, :Wp * pool:pool, :].set(wfc_r.astype(jnp.float32))

    num_cores, vmem_limit = _tpu_generation()
    if b_tile is None:
        b_tile = _pick_b_tile(B, Cin, C2, W_pad, curr_pad, num_cores=num_cores)
    assert B % b_tile == 0 and (b_tile % 8 == 0 or b_tile == B), (B, b_tile)
    grid = (pl.cdiv(B, b_tile),)

    smem = pl.BlockSpec(memory_space=pltpu.MemorySpace.SMEM)
    vmem_full = pl.BlockSpec(memory_space=pltpu.MemorySpace.VMEM)
    in_specs = [
        pl.BlockSpec((Cin, b_tile, W_pad), lambda i: (0, i, 0)),  # x, batch-tiled
        smem, smem,                                               # w1, b1
        smem, smem,                                               # w2, b2
        vmem_full,                                                # wsel (small)
    ]
    out_specs = pl.BlockSpec((b_tile, num_classes), lambda i: (i, 0))

    flops = (2 * B * (W_pad * C1 * Cin                 # conv1
                      + curr_pad * C2 * C1 * K         # conv2
                      + L_pad * C2 * num_classes)      # fc (zero-expanded)
             + B * (C1 * W_pad + C2 * curr_pad))       # BN shifts
    cost = pl.CostEstimate(
        flops=int(flops),
        transcendentals=int(B * (C1 * W_pad + C2 * curr_pad)),    # tanh
        bytes_accessed=int(x_cbw.size * x_cbw.dtype.itemsize
                           + B * num_classes * 4
                           + (w1f.size + w2f.size + wsel.size + C1 + C2) * 4))

    kernel = functools.partial(_eegcnn_kernel, cin=Cin, c1=C1, c2=C2,
                               k_taps=K, pool=pool)
    return pl.pallas_call(
        kernel,
        out_shape=jax.ShapeDtypeStruct((B, num_classes), jnp.float32),
        grid=grid,
        in_specs=in_specs,
        out_specs=out_specs,
        compiler_params=pltpu.CompilerParams(
            dimension_semantics=("parallel",),     # shard batch tiles across TCs
            vmem_limit_bytes=vmem_limit),
        cost_estimate=cost,
    )(x_cbw, w1f, b1f, w2f, b2f, wsel)


def reference(x_nchw, params, *, pool):
    """Pure-JAX reference in the original NCHW / torch semantics."""
    w1, s1, b1, w2, s2, b2, wfc = params
    B, Cin, H, W = x_nchw.shape
    x = x_nchw.reshape(B, Cin, W).astype(jnp.float32)
    h1 = jnp.tanh(jnp.einsum('oc,bcw->bow', w1, x,
                             precision=lax.Precision.HIGHEST)
                  * s1[None, :, None] + b1[None, :, None])
    C2, C1, K = w2.shape
    curr = W - K + 1
    acc = jnp.zeros((B, C2, curr), jnp.float32)
    for k in range(K):
        acc = acc + jnp.einsum('oc,bcw->bow', w2[:, :, k], h1[:, :, k:k + curr],
                               precision=lax.Precision.HIGHEST)
    h2 = jnp.tanh(acc * s2[None, :, None] + b2[None, :, None])
    Wp = curr // pool
    hp = jnp.max(h2[:, :, :Wp * pool].reshape(B, C2, Wp, pool), axis=-1)
    flat = hp.reshape(B, C2 * Wp)                  # torch .view order: c2*Wp + wp
    return jnp.dot(flat, wfc.T, precision=lax.Precision.HIGHEST)


def _make_params(key, Cin, C1, C2, K, Wp, num_classes):
    k = jax.random.split(key, 12)
    w1 = jax.random.normal(k[0], (C1, Cin), jnp.float32) * 0.4
    w2 = jax.random.normal(k[1], (C2, C1, K), jnp.float32) * 0.3
    wfc = jax.random.normal(k[2], (num_classes, C2 * Wp), jnp.float32) * 0.2
    eps = 1e-5

    def bn_affine(kg, kb, km, kv, C):
        # Inference-mode BatchNorm2d folded into per-channel scale/shift.
        gamma = jax.random.uniform(kg, (C,), minval=0.5, maxval=1.5)
        beta = jax.random.normal(kb, (C,), jnp.float32) * 0.1
        mean = jax.random.normal(km, (C,), jnp.float32) * 0.1
        var = jax.random.uniform(kv, (C,), minval=0.5, maxval=1.5)
        scale = gamma / jnp.sqrt(var + eps)
        shift = beta - mean * scale
        return scale, shift

    s1, b1 = bn_affine(k[3], k[4], k[5], k[6], C1)
    s2, b2 = bn_affine(k[7], k[8], k[9], k[10], C2)
    return (w1, s1, b1, w2, s2, b2, wfc)


def _run_case(key, *, B, Cin, seq_len, K, pool, C1, C2, num_classes, b_tile=None):
    curr = seq_len - K + 1
    Wp = curr // pool
    kx, kp = jax.random.split(key)
    x = jax.random.normal(kx, (B, Cin, 1, seq_len), jnp.float32)
    params = _make_params(kp, Cin, C1, C2, K, Wp, num_classes)

    out = eegcnn_light_forward(x, params, pool=pool, b_tile=b_tile)
    out = jax.block_until_ready(out)
    ref = reference(x, params, pool=pool)
    assert out.shape == (B, num_classes)
    assert jnp.allclose(out, ref, atol=1e-4, rtol=1e-4), (out, ref)


if __name__ == "__main__":
    key = jax.random.PRNGKey(0)
    k0, k1 = jax.random.split(key)

    # Case 1: small shapes consistent with the module; b_tile chosen by the
    # generation-aware picker (single grid step on v5e/v6e, 2 steps on v7x).
    _run_case(k0, B=16, Cin=4, seq_len=32, K=5, pool=4,
              C1=3, C2=3, num_classes=4)

    # Case 2: sequence longer than one vreg row and not a lane multiple
    # (160 -> padded to 256), forced 2-step batch grid for pipeline coverage.
    _run_case(k1, B=16, Cin=4, seq_len=160, K=17, pool=4,
              C1=3, C2=3, num_classes=4, b_tile=8)

    print("KERNEL_OK")
</pallas_src>

<mosaic_0001>
module attributes {stable_mosaic.version = 11 : i64} {
  func.func @_eegcnn_kernel(%arg0: i32, %arg1: memref<4x16x32xf32, #tpu.memory_space<vmem>>, %arg2: memref<12xf32, #tpu.memory_space<smem>>, %arg3: memref<3xf32, #tpu.memory_space<smem>>, %arg4: memref<45xf32, #tpu.memory_space<smem>>, %arg5: memref<3xf32, #tpu.memory_space<smem>>, %arg6: memref<3x25x4xf32, #tpu.memory_space<vmem>>, %arg7: memref<16x4xf32, #tpu.memory_space<vmem>>) attributes {dimension_semantics = [#tpu.dimension_semantics<parallel>], iteration_bounds = array<i64: 1>, scalar_prefetch = 0 : i64, scratch_operands = 0 : i64, tpu.core_type = #tpu.core_type<tc>, window_params = [{transform_indices = @transform_0, window_bounds = array<i64: 4, 16, 32>}, {transform_indices = @transform_1, window_bounds = array<i64: 12>}, {transform_indices = @transform_2, window_bounds = array<i64: 3>}, {transform_indices = @transform_3, window_bounds = array<i64: 45>}, {transform_indices = @transform_4, window_bounds = array<i64: 3>}, {pipeline_mode = #tpu.pipeline_mode<synchronous>, transform_indices = @transform_5, window_bounds = array<i64: 3, 25, 4>}, {transform_indices = @transform_6, window_bounds = array<i64: 16, 4>}]} {
    %c0 = arith.constant 0 : index
    %c0_0 = arith.constant 0 : index
    %c0_1 = arith.constant 0 : index
    %0 = vector.load %arg1[%c0, %c0_0, %c0_1] : memref<4x16x32xf32, #tpu.memory_space<vmem>>, vector<1x16x32xf32>
    %1 = vector.shape_cast %0 : vector<1x16x32xf32> to vector<16x32xf32>
    %c1 = arith.constant 1 : index
    %c0_2 = arith.constant 0 : index
    %c0_3 = arith.constant 0 : index
    %2 = vector.load %arg1[%c1, %c0_2, %c0_3] : memref<4x16x32xf32, #tpu.memory_space<vmem>>, vector<1x16x32xf32>
    %3 = vector.shape_cast %2 : vector<1x16x32xf32> to vector<16x32xf32>
    %c2 = arith.constant 2 : index
    %c0_4 = arith.constant 0 : index
    %c0_5 = arith.constant 0 : index
    %4 = vector.load %arg1[%c2, %c0_4, %c0_5] : memref<4x16x32xf32, #tpu.memory_space<vmem>>, vector<1x16x32xf32>
    %5 = vector.shape_cast %4 : vector<1x16x32xf32> to vector<16x32xf32>
    %c3 = arith.constant 3 : index
    %c0_6 = arith.constant 0 : index
    %c0_7 = arith.constant 0 : index
    %6 = vector.load %arg1[%c3, %c0_6, %c0_7] : memref<4x16x32xf32, #tpu.memory_space<vmem>>, vector<1x16x32xf32>
    %7 = vector.shape_cast %6 : vector<1x16x32xf32> to vector<16x32xf32>
    %c0_8 = arith.constant 0 : index
    %8 = memref.load %arg2[%c0_8] : memref<12xf32, #tpu.memory_space<smem>>
    %9 = vector.broadcast %8 : f32 to vector<16x32xf32>
    %10 = arith.mulf %9, %1 : vector<16x32xf32>
    %c1_9 = arith.constant 1 : index
    %11 = memref.load %arg2[%c1_9] : memref<12xf32, #tpu.memory_space<smem>>
    %12 = vector.broadcast %11 : f32 to vector<16x32xf32>
    %13 = arith.mulf %12, %3 : vector<16x32xf32>
    %14 = arith.addf %10, %13 : vector<16x32xf32>
    %c2_10 = arith.constant 2 : index
    %15 = memref.load %arg2[%c2_10] : memref<12xf32, #tpu.memory_space<smem>>
    %16 = vector.broadcast %15 : f32 to vector<16x32xf32>
    %17 = arith.mulf %16, %5 : vector<16x32xf32>
    %18 = arith.addf %14, %17 : vector<16x32xf32>
    %c3_11 = arith.constant 3 : index
    %19 = memref.load %arg2[%c3_11] : memref<12xf32, #tpu.memory_space<smem>>
    %20 = vector.broadcast %19 : f32 to vector<16x32xf32>
    %21 = arith.mulf %20, %7 : vector<16x32xf32>
    %22 = arith.addf %18, %21 : vector<16x32xf32>
    %c0_12 = arith.constant 0 : index
    %23 = memref.load %arg3[%c0_12] : memref<3xf32, #tpu.memory_space<smem>>
    %24 = vector.broadcast %23 : f32 to vector<16x32xf32>
    %25 = arith.addf %22, %24 : vector<16x32xf32>
    %26 = math.tanh %25 : vector<16x32xf32>
    %27 = vector.extract_strided_slice %26 {offsets = [0, 0], sizes = [16, 28], strides = [1, 1]} : vector<16x32xf32> to vector<16x28xf32>
    %c0_13 = arith.constant 0 : index
    %28 = memref.load %arg4[%c0_13] : memref<45xf32, #tpu.memory_space<smem>>
    %29 = vector.broadcast %28 : f32 to vector<16x28xf32>
    %30 = arith.mulf %29, %27 : vector<16x28xf32>
    %c15 = arith.constant 15 : index
    %31 = memref.load %arg4[%c15] : memref<45xf32, #tpu.memory_space<smem>>
    %32 = vector.broadcast %31 : f32 to vector<16x28xf32>
    %33 = arith.mulf %32, %27 : vector<16x28xf32>
    %c30 = arith.constant 30 : index
    %34 = memref.load %arg4[%c30] : memref<45xf32, #tpu.memory_space<smem>>
    %35 = vector.broadcast %34 : f32 to vector<16x28xf32>
    %36 = arith.mulf %35, %27 : vector<16x28xf32>
    %37 = vector.extract_strided_slice %26 {offsets = [0, 1], sizes = [16, 28], strides = [1, 1]} : vector<16x32xf32> to vector<16x28xf32>
    %c1_14 = arith.constant 1 : index
    %38 = memref.load %arg4[%c1_14] : memref<45xf32, #tpu.memory_space<smem>>
    %39 = vector.broadcast %38 : f32 to vector<16x28xf32>
    %40 = arith.mulf %39, %37 : vector<16x28xf32>
    %41 = arith.addf %30, %40 : vector<16x28xf32>
    %c16 = arith.constant 16 : index
    %42 = memref.load %arg4[%c16] : memref<45xf32, #tpu.memory_space<smem>>
    %43 = vector.broadcast %42 : f32 to vector<16x28xf32>
    %44 = arith.mulf %43, %37 : vector<16x28xf32>
    %45 = arith.addf %33, %44 : vector<16x28xf32>
    %c31 = arith.constant 31 : index
    %46 = memref.load %arg4[%c31] : memref<45xf32, #tpu.memory_space<smem>>
    %47 = vector.broadcast %46 : f32 to vector<16x28xf32>
    %48 = arith.mulf %47, %37 : vector<16x28xf32>
    %49 = arith.addf %36, %48 : vector<16x28xf32>
    %50 = vector.extract_strided_slice %26 {offsets = [0, 2], sizes = [16, 28], strides = [1, 1]} : vector<16x32xf32> to vector<16x28xf32>
    %c2_15 = arith.constant 2 : index
    %51 = memref.load %arg4[%c2_15] : memref<45xf32, #tpu.memory_space<smem>>
    %52 = vector.broadcast %51 : f32 to vector<16x28xf32>
    %53 = arith.mulf %52, %50 : vector<16x28xf32>
    %54 = arith.addf %41, %53 : vector<16x28xf32>
    %c17 = arith.constant 17 : index
    %55 = memref.load %arg4[%c17] : memref<45xf32, #tpu.memory_space<smem>>
    %56 = vector.broadcast %55 : f32 to vector<16x28xf32>
    %57 = arith.mulf %56, %50 : vector<16x28xf32>
    %58 = arith.addf %45, %57 : vector<16x28xf32>
    %c32 = arith.constant 32 : index
    %59 = memref.load %arg4[%c32] : memref<45xf32, #tpu.memory_space<smem>>
    %60 = vector.broadcast %59 : f32 to vector<16x28xf32>
    %61 = arith.mulf %60, %50 : vector<16x28xf32>
    %62 = arith.addf %49, %61 : vector<16x28xf32>
    %63 = vector.extract_strided_slice %26 {offsets = [0, 3], sizes = [16, 28], strides = [1, 1]} : vector<16x32xf32> to vector<16x28xf32>
    %c3_16 = arith.constant 3 : index
    %64 = memref.load %arg4[%c3_16] : memref<45xf32, #tpu.memory_space<smem>>
    %65 = vector.broadcast %64 : f32 to vector<16x28xf32>
    %66 = arith.mulf %65, %63 : vector<16x28xf32>
    %67 = arith.addf %54, %66 : vector<16x28xf32>
    %c18 = arith.constant 18 : index
    %68 = memref.load %arg4[%c18] : memref<45xf32, #tpu.memory_space<smem>>
    %69 = vector.broadcast %68 : f32 to vector<16x28xf32>
    %70 = arith.mulf %69, %63 : vector<16x28xf32>
    %71 = arith.addf %58, %70 : vector<16x28xf32>
    %c33 = arith.constant 33 : index
    %72 = memref.load %arg4[%c33] : memref<45xf32, #tpu.memory_space<smem>>
    %73 = vector.broadcast %72 : f32 to vector<16x28xf32>
    %74 = arith.mulf %73, %63 : vector<16x28xf32>
    %75 = arith.addf %62, %74 : vector<16x28xf32>
    %76 = vector.extract_strided_slice %26 {offsets = [0, 4], sizes = [16, 28], strides = [1, 1]} : vector<16x32xf32> to vector<16x28xf32>
    %c4 = arith.constant 4 : index
    %77 = memref.load %arg4[%c4] : memref<45xf32, #tpu.memory_space<smem>>
    %78 = vector.broadcast %77 : f32 to vector<16x28xf32>
    %79 = arith.mulf %78, %76 : vector<16x28xf32>
    %80 = arith.addf %67, %79 : vector<16x28xf32>
    %c19 = arith.constant 19 : index
    %81 = memref.load %arg4[%c19] : memref<45xf32, #tpu.memory_space<smem>>
    %82 = vector.broadcast %81 : f32 to vector<16x28xf32>
    %83 = arith.mulf %82, %76 : vector<16x28xf32>
    %84 = arith.addf %71, %83 : vector<16x28xf32>
    %c34 = arith.constant 34 : index
    %85 = memref.load %arg4[%c34] : memref<45xf32, #tpu.memory_space<smem>>
    %86 = vector.broadcast %85 : f32 to vector<16x28xf32>
    %87 = arith.mulf %86, %76 : vector<16x28xf32>
    %88 = arith.addf %75, %87 : vector<16x28xf32>
    %c4_17 = arith.constant 4 : index
    %89 = memref.load %arg2[%c4_17] : memref<12xf32, #tpu.memory_space<smem>>
    %90 = vector.broadcast %89 : f32 to vector<16x32xf32>
    %91 = arith.mulf %90, %1 : vector<16x32xf32>
    %c5 = arith.constant 5 : index
    %92 = memref.load %arg2[%c5] : memref<12xf32, #tpu.memory_space<smem>>
    %93 = vector.broadcast %92 : f32 to vector<16x32xf32>
    %94 = arith.mulf %93, %3 : vector<16x32xf32>
    %95 = arith.addf %91, %94 : vector<16x32xf32>
    %c6 = arith.constant 6 : index
    %96 = memref.load %arg2[%c6] : memref<12xf32, #tpu.memory_space<smem>>
    %97 = vector.broadcast %96 : f32 to vector<16x32xf32>
    %98 = arith.mulf %97, %5 : vector<16x32xf32>
    %99 = arith.addf %95, %98 : vector<16x32xf32>
    %c7 = arith.constant 7 : index
    %100 = memref.load %arg2[%c7] : memref<12xf32, #tpu.memory_space<smem>>
    %101 = vector.broadcast %100 : f32 to vector<16x32xf32>
    %102 = arith.mulf %101, %7 : vector<16x32xf32>
    %103 = arith.addf %99, %102 : vector<16x32xf32>
    %c1_18 = arith.constant 1 : index
    %104 = memref.load %arg3[%c1_18] : memref<3xf32, #tpu.memory_space<smem>>
    %105 = vector.broadcast %104 : f32 to vector<16x32xf32>
    %106 = arith.addf %103, %105 : vector<16x32xf32>
    %107 = math.tanh %106 : vector<16x32xf32>
    %108 = vector.extract_strided_slice %107 {offsets = [0, 0], sizes = [16, 28], strides = [1, 1]} : vector<16x32xf32> to vector<16x28xf32>
    %c5_19 = arith.constant 5 : index
    %109 = memref.load %arg4[%c5_19] : memref<45xf32, #tpu.memory_space<smem>>
    %110 = vector.broadcast %109 : f32 to vector<16x28xf32>
    %111 = arith.mulf %110, %108 : vector<16x28xf32>
    %112 = arith.addf %80, %111 : vector<16x28xf32>
    %c20 = arith.constant 20 : index
    %113 = memref.load %arg4[%c20] : memref<45xf32, #tpu.memory_space<smem>>
    %114 = vector.broadcast %113 : f32 to vector<16x28xf32>
    %115 = arith.mulf %114, %108 : vector<16x28xf32>
    %116 = arith.addf %84, %115 : vector<16x28xf32>
    %c35 = arith.constant 35 : index
    %117 = memref.load %arg4[%c35] : memref<45xf32, #tpu.memory_space<smem>>
    %118 = vector.broadcast %117 : f32 to vector<16x28xf32>
    %119 = arith.mulf %118, %108 : vector<16x28xf32>
    %120 = arith.addf %88, %119 : vector<16x28xf32>
    %121 = vector.extract_strided_slice %107 {offsets = [0, 1], sizes = [16, 28], strides = [1, 1]} : vector<16x32xf32> to vector<16x28xf32>
    %c6_20 = arith.constant 6 : index
    %122 = memref.load %arg4[%c6_20] : memref<45xf32, #tpu.memory_space<smem>>
    %123 = vector.broadcast %122 : f32 to vector<16x28xf32>
    %124 = arith.mulf %123, %121 : vector<16x28xf32>
    %125 = arith.addf %112, %124 : vector<16x28xf32>
    %c21 = arith.constant 21 : index
    %126 = memref.load %arg4[%c21] : memref<45xf32, #tpu.memory_space<smem>>
    %127 = vector.broadcast %126 : f32 to vector<16x28xf32>
    %128 = arith.mulf %127, %121 : vector<16x28xf32>
    %129 = arith.addf %116, %128 : vector<16x28xf32>
    %c36 = arith.constant 36 : index
    %130 = memref.load %arg4[%c36] : memref<45xf32, #tpu.memory_space<smem>>
    %131 = vector.broadcast %130 : f32 to vector<16x28xf32>
    %132 = arith.mulf %131, %121 : vector<16x28xf32>
    %133 = arith.addf %120, %132 : vector<16x28xf32>
    %134 = vector.extract_strided_slice %107 {offsets = [0, 2], sizes = [16, 28], strides = [1, 1]} : vector<16x32xf32> to vector<16x28xf32>
    %c7_21 = arith.constant 7 : index
    %135 = memref.load %arg4[%c7_21] : memref<45xf32, #tpu.memory_space<smem>>
    %136 = vector.broadcast %135 : f32 to vector<16x28xf32>
    %137 = arith.mulf %136, %134 : vector<16x28xf32>
    %138 = arith.addf %125, %137 : vector<16x28xf32>
    %c22 = arith.constant 22 : index
    %139 = memref.load %arg4[%c22] : memref<45xf32, #tpu.memory_space<smem>>
    %140 = vector.broadcast %139 : f32 to vector<16x28xf32>
    %141 = arith.mulf %140, %134 : vector<16x28xf32>
    %142 = arith.addf %129, %141 : vector<16x28xf32>
    %c37 = arith.constant 37 : index
    %143 = memref.load %arg4[%c37] : memref<45xf32, #tpu.memory_space<smem>>
    %144 = vector.broadcast %143 : f32 to vector<16x28xf32>
    %145 = arith.mulf %144, %134 : vector<16x28xf32>
    %146 = arith.addf %133, %145 : vector<16x28xf32>
    %147 = vector.extract_strided_slice %107 {offsets = [0, 3], sizes = [16, 28], strides = [1, 1]} : vector<16x32xf32> to vector<16x28xf32>
    %c8 = arith.constant 8 : index
    %148 = memref.load %arg4[%c8] : memref<45xf32, #tpu.memory_space<smem>>
    %149 = vector.broadcast %148 : f32 to vector<16x28xf32>
    %150 = arith.mulf %149, %147 : vector<16x28xf32>
    %151 = arith.addf %138, %150 : vector<16x28xf32>
    %c23 = arith.constant 23 : index
    %152 = memref.load %arg4[%c23] : memref<45xf32, #tpu.memory_space<smem>>
    %153 = vector.broadcast %152 : f32 to vector<16x28xf32>
    %154 = arith.mulf %153, %147 : vector<16x28xf32>
    %155 = arith.addf %142, %154 : vector<16x28xf32>
    %c38 = arith.constant 38 : index
    %156 = memref.load %arg4[%c38] : memref<45xf32, #tpu.memory_space<smem>>
    %157 = vector.broadcast %156 : f32 to vector<16x28xf32>
    %158 = arith.mulf %157, %147 : vector<16x28xf32>
    %159 = arith.addf %146, %158 : vector<16x28xf32>
    %160 = vector.extract_strided_slice %107 {offsets = [0, 4], sizes = [16, 28], strides = [1, 1]} : vector<16x32xf32> to vector<16x28xf32>
    %c9 = arith.constant 9 : index
    %161 = memref.load %arg4[%c9] : memref<45xf32, #tpu.memory_space<smem>>
    %162 = vector.broadcast %161 : f32 to vector<16x28xf32>
    %163 = arith.mulf %162, %160 : vector<16x28xf32>
    %164 = arith.addf %151, %163 : vector<16x28xf32>
    %c24 = arith.constant 24 : index
    %165 = memref.load %arg4[%c24] : memref<45xf32, #tpu.memory_space<smem>>
    %166 = vector.broadcast %165 : f32 to vector<16x28xf32>
    %167 = arith.mulf %166, %160 : vector<16x28xf32>
    %168 = arith.addf %155, %167 : vector<16x28xf32>
    %c39 = arith.constant 39 : index
    %169 = memref.load %arg4[%c39] : memref<45xf32, #tpu.memory_space<smem>>
    %170 = vector.broadcast %169 : f32 to vector<16x28xf32>
    %171 = arith.mulf %170, %160 : vector<16x28xf32>
    %172 = arith.addf %159, %171 : vector<16x28xf32>
    %c8_22 = arith.constant 8 : index
    %173 = memref.load %arg2[%c8_22] : memref<12xf32, #tpu.memory_space<smem>>
    %174 = vector.broadcast %173 : f32 to vector<16x32xf32>
    %175 = arith.mulf %174, %1 : vector<16x32xf32>
    %c9_23 = arith.constant 9 : index
    %176 = memref.load %arg2[%c9_23] : memref<12xf32, #tpu.memory_space<smem>>
    %177 = vector.broadcast %176 : f32 to vector<16x32xf32>
    %178 = arith.mulf %177, %3 : vector<16x32xf32>
    %179 = arith.addf %175, %178 : vector<16x32xf32>
    %c10 = arith.constant 10 : index
    %180 = memref.load %arg2[%c10] : memref<12xf32, #tpu.memory_space<smem>>
    %181 = vector.broadcast %180 : f32 to vector<16x32xf32>
    %182 = arith.mulf %181, %5 : vector<16x32xf32>
    %183 = arith.addf %179, %182 : vector<16x32xf32>
    %c11 = arith.constant 11 : index
    %184 = memref.load %arg2[%c11] : memref<12xf32, #tpu.memory_space<smem>>
    %185 = vector.broadcast %184 : f32 to vector<16x32xf32>
    %186 = arith.mulf %185, %7 : vector<16x32xf32>
    %187 = arith.addf %183, %186 : vector<16x32xf32>
    %c2_24 = arith.constant 2 : index
    %188 = memref.load %arg3[%c2_24] : memref<3xf32, #tpu.memory_space<smem>>
    %189 = vector.broadcast %188 : f32 to vector<16x32xf32>
    %190 = arith.addf %187, %189 : vector<16x32xf32>
    %191 = math.tanh %190 : vector<16x32xf32>
    %192 = vector.extract_strided_slice %191 {offsets = [0, 0], sizes = [16, 28], strides = [1, 1]} : vector<16x32xf32> to vector<16x28xf32>
    %c10_25 = arith.constant 10 : index
    %193 = memref.load %arg4[%c10_25] : memref<45xf32, #tpu.memory_space<smem>>
    %194 = vector.broadcast %193 : f32 to vector<16x28xf32>
    %195 = arith.mulf %194, %192 : vector<16x28xf32>
    %196 = arith.addf %164, %195 : vector<16x28xf32>
    %c25 = arith.constant 25 : index
    %197 = memref.load %arg4[%c25] : memref<45xf32, #tpu.memory_space<smem>>
    %198 = vector.broadcast %197 : f32 to vector<16x28xf32>
    %199 = arith.mulf %198, %192 : vector<16x28xf32>
    %200 = arith.addf %168, %199 : vector<16x28xf32>
    %c40 = arith.constant 40 : index
    %201 = memref.load %arg4[%c40] : memref<45xf32, #tpu.memory_space<smem>>
    %202 = vector.broadcast %201 : f32 to vector<16x28xf32>
    %203 = arith.mulf %202, %192 : vector<16x28xf32>
    %204 = arith.addf %172, %203 : vector<16x28xf32>
    %205 = vector.extract_strided_slice %191 {offsets = [0, 1], sizes = [16, 28], strides = [1, 1]} : vector<16x32xf32> to vector<16x28xf32>
    %c11_26 = arith.constant 11 : index
    %206 = memref.load %arg4[%c11_26] : memref<45xf32, #tpu.memory_space<smem>>
    %207 = vector.broadcast %206 : f32 to vector<16x28xf32>
    %208 = arith.mulf %207, %205 : vector<16x28xf32>
    %209 = arith.addf %196, %208 : vector<16x28xf32>
    %c26 = arith.constant 26 : index
    %210 = memref.load %arg4[%c26] : memref<45xf32, #tpu.memory_space<smem>>
    %211 = vector.broadcast %210 : f32 to vector<16x28xf32>
    %212 = arith.mulf %211, %205 : vector<16x28xf32>
    %213 = arith.addf %200, %212 : vector<16x28xf32>
    %c41 = arith.constant 41 : index
    %214 = memref.load %arg4[%c41] : memref<45xf32, #tpu.memory_space<smem>>
    %215 = vector.broadcast %214 : f32 to vector<16x28xf32>
    %216 = arith.mulf %215, %205 : vector<16x28xf32>
    %217 = arith.addf %204, %216 : vector<16x28xf32>
    %218 = vector.extract_strided_slice %191 {offsets = [0, 2], sizes = [16, 28], strides = [1, 1]} : vector<16x32xf32> to vector<16x28xf32>
    %c12 = arith.constant 12 : index
    %219 = memref.load %arg4[%c12] : memref<45xf32, #tpu.memory_space<smem>>
    %220 = vector.broadcast %219 : f32 to vector<16x28xf32>
    %221 = arith.mulf %220, %218 : vector<16x28xf32>
    %222 = arith.addf %209, %221 : vector<16x28xf32>
    %c27 = arith.constant 27 : index
    %223 = memref.load %arg4[%c27] : memref<45xf32, #tpu.memory_space<smem>>
    %224 = vector.broadcast %223 : f32 to vector<16x28xf32>
    %225 = arith.mulf %224, %218 : vector<16x28xf32>
    %226 = arith.addf %213, %225 : vector<16x28xf32>
    %c42 = arith.constant 42 : index
    %227 = memref.load %arg4[%c42] : memref<45xf32, #tpu.memory_space<smem>>
    %228 = vector.broadcast %227 : f32 to vector<16x28xf32>
    %229 = arith.mulf %228, %218 : vector<16x28xf32>
    %230 = arith.addf %217, %229 : vector<16x28xf32>
    %231 = vector.extract_strided_slice %191 {offsets = [0, 3], sizes = [16, 28], strides = [1, 1]} : vector<16x32xf32> to vector<16x28xf32>
    %c13 = arith.constant 13 : index
    %232 = memref.load %arg4[%c13] : memref<45xf32, #tpu.memory_space<smem>>
    %233 = vector.broadcast %232 : f32 to vector<16x28xf32>
    %234 = arith.mulf %233, %231 : vector<16x28xf32>
    %235 = arith.addf %222, %234 : vector<16x28xf32>
    %c28 = arith.constant 28 : index
    %236 = memref.load %arg4[%c28] : memref<45xf32, #tpu.memory_space<smem>>
    %237 = vector.broadcast %236 : f32 to vector<16x28xf32>
    %238 = arith.mulf %237, %231 : vector<16x28xf32>
    %239 = arith.addf %226, %238 : vector<16x28xf32>
    %c43 = arith.constant 43 : index
    %240 = memref.load %arg4[%c43] : memref<45xf32, #tpu.memory_space<smem>>
    %241 = vector.broadcast %240 : f32 to vector<16x28xf32>
    %242 = arith.mulf %241, %231 : vector<16x28xf32>
    %243 = arith.addf %230, %242 : vector<16x28xf32>
    %244 = vector.extract_strided_slice %191 {offsets = [0, 4], sizes = [16, 28], strides = [1, 1]} : vector<16x32xf32> to vector<16x28xf32>
    %c14 = arith.constant 14 : index
    %245 = memref.load %arg4[%c14] : memref<45xf32, #tpu.memory_space<smem>>
    %246 = vector.broadcast %245 : f32 to vector<16x28xf32>
    %247 = arith.mulf %246, %244 : vector<16x28xf32>
    %248 = arith.addf %235, %247 : vector<16x28xf32>
    %c29 = arith.constant 29 : index
    %249 = memref.load %arg4[%c29] : memref<45xf32, #tpu.memory_space<smem>>
    %250 = vector.broadcast %249 : f32 to vector<16x28xf32>
    %251 = arith.mulf %250, %244 : vector<16x28xf32>
    %252 = arith.addf %239, %251 : vector<16x28xf32>
    %c44 = arith.constant 44 : index
    %253 = memref.load %arg4[%c44] : memref<45xf32, #tpu.memory_space<smem>>
    %254 = vector.broadcast %253 : f32 to vector<16x28xf32>
    %255 = arith.mulf %254, %244 : vector<16x28xf32>
    %256 = arith.addf %243, %255 : vector<16x28xf32>
    %c0_27 = arith.constant 0 : index
    %257 = memref.load %arg5[%c0_27] : memref<3xf32, #tpu.memory_space<smem>>
    %258 = vector.broadcast %257 : f32 to vector<16x28xf32>
    %259 = arith.addf %248, %258 : vector<16x28xf32>
    %260 = math.tanh %259 : vector<16x28xf32>
    %261 = vector.extract_strided_slice %260 {offsets = [0, 0], sizes = [16, 25], strides = [1, 1]} : vector<16x28xf32> to vector<16x25xf32>
    %262 = vector.extract_strided_slice %260 {offsets = [0, 1], sizes = [16, 25], strides = [1, 1]} : vector<16x28xf32> to vector<16x25xf32>
    %263 = arith.maximumf %261, %262 : vector<16x25xf32>
    %264 = vector.extract_strided_slice %260 {offsets = [0, 2], sizes = [16, 25], strides = [1, 1]} : vector<16x28xf32> to vector<16x25xf32>
    %265 = arith.maximumf %263, %264 : vector<16x25xf32>
    %266 = vector.extract_strided_slice %260 {offsets = [0, 3], sizes = [16, 25], strides = [1, 1]} : vector<16x28xf32> to vector<16x25xf32>
    %267 = arith.maximumf %265, %266 : vector<16x25xf32>
    %c0_28 = arith.constant 0 : index
    %c0_29 = arith.constant 0 : index
    %c0_30 = arith.constant 0 : index
    %268 = vector.load %arg6[%c0_28, %c0_29, %c0_30] : memref<3x25x4xf32, #tpu.memory_space<vmem>>, vector<1x25x4xf32>
    %269 = vector.shape_cast %268 : vector<1x25x4xf32> to vector<25x4xf32>
    %cst = arith.constant dense<0.000000e+00> : vector<16x4xf32>
    %270 = tpu.matmul %267, %269, %cst {dimension_numbers = #tpu.dot_dimension_numbers<[1], [0], [0], [1], [0, 0, 1, 1], [], []>, precision = #tpu.contract_precision<fp32>} : vector<16x25xf32>, vector<25x4xf32>, vector<16x4xf32> -> vector<16x4xf32>
    %c1_31 = arith.constant 1 : index
    %271 = memref.load %arg5[%c1_31] : memref<3xf32, #tpu.memory_space<smem>>
    %272 = vector.broadcast %271 : f32 to vector<16x28xf32>
    %273 = arith.addf %252, %272 : vector<16x28xf32>
    %274 = math.tanh %273 : vector<16x28xf32>
    %275 = vector.extract_strided_slice %274 {offsets = [0, 0], sizes = [16, 25], strides = [1, 1]} : vector<16x28xf32> to vector<16x25xf32>
    %276 = vector.extract_strided_slice %274 {offsets = [0, 1], sizes = [16, 25], strides = [1, 1]} : vector<16x28xf32> to vector<16x25xf32>
    %277 = arith.maximumf %275, %276 : vector<16x25xf32>
    %278 = vector.extract_strided_slice %274 {offsets = [0, 2], sizes = [16, 25], strides = [1, 1]} : vector<16x28xf32> to vector<16x25xf32>
    %279 = arith.maximumf %277, %278 : vector<16x25xf32>
    %280 = vector.extract_strided_slice %274 {offsets = [0, 3], sizes = [16, 25], strides = [1, 1]} : vector<16x28xf32> to vector<16x25xf32>
    %281 = arith.maximumf %279, %280 : vector<16x25xf32>
    %c1_32 = arith.constant 1 : index
    %c0_33 = arith.constant 0 : index
    %c0_34 = arith.constant 0 : index
    %282 = vector.load %arg6[%c1_32, %c0_33, %c0_34] : memref<3x25x4xf32, #tpu.memory_space<vmem>>, vector<1x25x4xf32>
    %283 = vector.shape_cast %282 : vector<1x25x4xf32> to vector<25x4xf32>
    %cst_35 = arith.constant dense<0.000000e+00> : vector<16x4xf32>
    %284 = tpu.matmul %281, %283, %cst_35 {dimension_numbers = #tpu.dot_dimension_numbers<[1], [0], [0], [1], [0, 0, 1, 1], [], []>, precision = #tpu.contract_precision<fp32>} : vector<16x25xf32>, vector<25x4xf32>, vector<16x4xf32> -> vector<16x4xf32>
    %285 = arith.addf %270, %284 : vector<16x4xf32>
    %c2_36 = arith.constant 2 : index
    %286 = memref.load %arg5[%c2_36] : memref<3xf32, #tpu.memory_space<smem>>
    %287 = vector.broadcast %286 : f32 to vector<16x28xf32>
    %288 = arith.addf %256, %287 : vector<16x28xf32>
    %289 = math.tanh %288 : vector<16x28xf32>
    %290 = vector.extract_strided_slice %289 {offsets = [0, 0], sizes = [16, 25], strides = [1, 1]} : vector<16x28xf32> to vector<16x25xf32>
    %291 = vector.extract_strided_slice %289 {offsets = [0, 1], sizes = [16, 25], strides = [1, 1]} : vector<16x28xf32> to vector<16x25xf32>
    %292 = arith.maximumf %290, %291 : vector<16x25xf32>
    %293 = vector.extract_strided_slice %289 {offsets = [0, 2], sizes = [16, 25], strides = [1, 1]} : vector<16x28xf32> to vector<16x25xf32>
    %294 = arith.maximumf %292, %293 : vector<16x25xf32>
    %295 = vector.extract_strided_slice %289 {offsets = [0, 3], sizes = [16, 25], strides = [1, 1]} : vector<16x28xf32> to vector<16x25xf32>
    %296 = arith.maximumf %294, %295 : vector<16x25xf32>
    %c2_37 = arith.constant 2 : index
    %c0_38 = arith.constant 0 : index
    %c0_39 = arith.constant 0 : index
    %297 = vector.load %arg6[%c2_37, %c0_38, %c0_39] : memref<3x25x4xf32, #tpu.memory_space<vmem>>, vector<1x25x4xf32>
    %298 = vector.shape_cast %297 : vector<1x25x4xf32> to vector<25x4xf32>
    %cst_40 = arith.constant dense<0.000000e+00> : vector<16x4xf32>
    %299 = tpu.matmul %296, %298, %cst_40 {dimension_numbers = #tpu.dot_dimension_numbers<[1], [0], [0], [1], [0, 0, 1, 1], [], []>, precision = #tpu.contract_precision<fp32>} : vector<16x25xf32>, vector<25x4xf32>, vector<16x4xf32> -> vector<16x4xf32>
    %300 = arith.addf %285, %299 : vector<16x4xf32>
    %c0_41 = arith.constant 0 : index
    %c0_42 = arith.constant 0 : index
    %301 = vector.load %arg7[%c0_41, %c0_42] : memref<16x4xf32, #tpu.memory_space<vmem>>, vector<16x4xf32>
    tpu.vector_store %arg7[%c0_41, %c0_42], %300 {strides = array<i32>} : memref<16x4xf32, #tpu.memory_space<vmem>>, vector<16x4xf32>,
    return
  }
  func.func @transform_0(%arg0: i32) -> (i32, i32, i32) {
    %c0_i32 = arith.constant 0 : i32
    %c0_i32_0 = arith.constant 0 : i32
    %c0_i32_1 = arith.constant 0 : i32
    return %c0_i32, %arg0, %c0_i32_0 : i32, i32, i32
  }
  func.func @transform_1(%arg0: i32) -> i32 {
    %c0_i32 = arith.constant 0 : i32
    %c0_i32_0 = arith.constant 0 : i32
    return %c0_i32 : i32
  }
  func.func @transform_2(%arg0: i32) -> i32 {
    %c0_i32 = arith.constant 0 : i32
    %c0_i32_0 = arith.constant 0 : i32
    return %c0_i32 : i32
  }
  func.func @transform_3(%arg0: i32) -> i32 {
    %c0_i32 = arith.constant 0 : i32
    %c0_i32_0 = arith.constant 0 : i32
    return %c0_i32 : i32
  }
  func.func @transform_4(%arg0: i32) -> i32 {
    %c0_i32 = arith.constant 0 : i32
    %c0_i32_0 = arith.constant 0 : i32
    return %c0_i32 : i32
  }
  func.func @transform_5(%arg0: i32) -> (i32, i32, i32) {
    %c0_i32 = arith.constant 0 : i32
    %c0_i32_0 = arith.constant 0 : i32
    %c0_i32_1 = arith.constant 0 : i32
    %c0_i32_2 = arith.constant 0 : i32
    return %c0_i32, %c0_i32_0, %c0_i32_1 : i32, i32, i32
  }
  func.func @transform_6(%arg0: i32) -> (i32, i32) {
    %c0_i32 = arith.constant 0 : i32
    %c0_i32_0 = arith.constant 0 : i32
    return %arg0, %c0_i32 : i32, i32
  }
}

</mosaic_0001>

<bundles_post_ra>
// kernel: tpu_custom_call.1
= control target key start
LH: loop header
LB: loop body
LE: loop exit
PB: predicated region body
PF: predicated region fallthrough
CT: control target
= control target key end

     0   :  { %11 = vsyncpa [#allocation3], 0  ;;  %s2348_s0 = inlined_call_operand.vmem [shape: f32[4,16,32], index: 0, kind: input, shape index: {}]   ;;  %s2349_s1 = inlined_call_operand.vmem [shape: f32[12], index: 1, kind: input, shape index: {}]   ;;  %s2350_s2 = inlined_call_operand.vmem [shape: f32[3], index: 2, kind: input, shape index: {}]   ;;  %s2351_s3 = inlined_call_operand.vmem [shape: f32[45], index: 3, kind: input, shape index: {}]   ;;  %s2352_s4 = inlined_call_operand.vmem [shape: f32[3], index: 4, kind: input, shape index: {}]   ;;  %s2353_s5 = inlined_call_operand.vmem [shape: f32[3,25,4], index: 5, kind: input, shape index: {}]   ;;  %s2354_s6 = inlined_call_operand.vmem [shape: f32[16,4], index: 6, kind: output, shape index: {}]  }
   0x1   :  { %12 = vsyncpa [#allocation5], 0  ;;  %s30_s23 = sshll.u32 %s2350_s2, 4  ;;  %s31_s23 = int_to_ptr.vmem [resolvable:$true] %s30_s23 }
   0x2   :  { %13 = vsyncpa [#allocation8], 0  ;;  %s21_s26 = sshll.u32 %s2349_s1, 4  ;;  %s1684_s27 = smov [#allocation4]   ;;  %s22_s26 = int_to_ptr.vmem [resolvable:$true] %s21_s26 }
   0x3   :  { %33 = dma.vmem_to_smem %s31_s23, 16, %s1684_s27, [#allocation5]  }
   0x4   :  { %s1685_s28 = smov [#allocation2]   ;;  %s39_s7 = sshll.u32 %s2351_s3, 4  ;;  %s40_s7 = int_to_ptr.vmem [resolvable:$true] %s39_s7 }
   0x5   :  { %24 = dma.vmem_to_smem %s22_s26, 16, %s1685_s28, [#allocation3]  }
   0x6   :  { %s48_s2 = sshll.u32 %s2352_s4, 4  ;;  %s1686_s10 = smov [#allocation6]   ;;  %s49_s2 = int_to_ptr.vmem [resolvable:$true] %s48_s2 }
   0x7   :  { %42 = dma.vmem_to_smem %s40_s7, 16, %s1686_s10, [#allocation5]  }
   0x8   :  { %s1687_s11 = smov [#allocation7]  }
   0x9   :  { %51 = dma.vmem_to_smem %s49_s2, 16, %s1687_s11, [#allocation8]  }
   0xa   :  { %1678 = dma.done.wait [#allocation3], 16  }
   0xb   :  { %1679 = vsyncadd [#allocation3], 4294967280 }
   0xc   :  { %1680 = dma.done.wait [#allocation5], 32  }
   0xd   :  { %1681 = vsyncadd [#allocation5], 4294967264 }
   0xe   :  { %1682 = dma.done.wait [#allocation8], 16  }
   0xf   :  { %1683 = vsyncadd [#allocation8], 4294967280 }
  0x10   :  { %70 = sfence }
  0x11   :  { %s82_s1 = sld [smem:[#allocation2]]  ;;  %v1742_v0 = vld [vmem:[%s2348_s0 + $0x8] sm:$0xff]  ;;  %v1747_v1 = vld [vmem:[%s2348_s0] sm:$0xff]  ;;  %v1752_v2 = vld [vmem:[%s2348_s0 + $0x10] sm:$0xff]  ;;  %s1688_s4 = smov 125   ;;  %vm798_vm0 = vcmask 1040384  }
  0x12   :  { %s1523_s12 = sld [smem:[#allocation2 + $0x1]]  ;;  %v1757_v3 = vld [vmem:[%s2348_s0 + $0x18] sm:$0xff]  ;;  %v1764_v4 = vld [vmem:[%s2348_s0 + $0x20] sm:$0xff]  ;;  %v1769_v5 = vld [vmem:[%s2348_s0 + $0x28] sm:$0xff]  ;;  %s1689_s16 = smov 127   ;;  %vm791_vm1 = vcmask 203776  }
  0x13   :  { %s1524_s3 = sld [smem:[#allocation2 + $0x2]]  ;;  %v1774_v7 = vld [vmem:[%s2348_s0 + $0x38] sm:$0xff]  ;;  %v1781_v11 = vld [vmem:[%s2348_s0 + $0x30] sm:$0xff]  ;;  %s1690_s19 = smov 124   ;;  %vm1507_vm2 = vcmask 31744  }
  0x14   :  { %s1525_s13 = sld [smem:[#allocation2 + $0x3]]  ;;  %s1691_s20 = smov 126  }
  0x15   :  { %s1759_s21 = sld [smem:[#allocation4]] }
  0x16   :  { %s1787_s30 = sld [smem:[#allocation2 + $0x4]] }
  0x17   :  { %v83_v6 = vstv %s82_s1  ;;  %s1790_s7 = sld [smem:[#allocation2 + $0x5]] }
  0x18   :  { %v85_v8 = vmul.f32 %v83_v6, %v1742_v0  ;;  %v87_v9 = vstv %s1523_s12  ;;  %v84_v10 = vmul.f32 %v83_v6, %v1747_v1  ;;  %s1793_s0 = sld [smem:[#allocation2 + $0x6]] }
  0x19   :  { %v88_v12 = vmul.f32 %v1752_v2, %v87_v9  ;;  %v89_v13 = vmul.f32 %v1757_v3, %v87_v9  ;;  %v93_v14 = vstv %s1524_s3  ;;  %s1795_s8 = sld [smem:[#allocation2 + $0x7]] }
  0x1a   :  { %v94_v15 = vmul.f32 %v1764_v4, %v93_v14  ;;  %v95_v16 = vmul.f32 %v1769_v5, %v93_v14  ;;  %v99_v17 = vstv %s1525_s13  ;;  %s1798_s9 = sld [smem:[#allocation6 + $0x12]] }
  0x1b   :  { %v91_v18 = vadd.f32 %v89_v13, %v85_v8  ;;  %v101_v19 = vmul.f32 %v1774_v7, %v99_v17  ;;  %v100_v20 = vmul.f32 %v1781_v11, %v99_v17  ;;  %v90_v21 = vadd.f32 %v88_v12, %v84_v10  ;;  %s1800_s2 = sld [smem:[#allocation6 + $0x10]] }
  0x1c   :  { %v105_v23 = vstv %s1759_s21  ;;  %v291_v27 = vstv %s1787_s30  ;;  %s1803_s10 = sld [smem:[#allocation4 + $0x1]] }
  0x1d   :  { %v97_v22 = vadd.f32 %v95_v16, %v91_v18  ;;  %v96_v24 = vadd.f32 %v94_v15, %v90_v21  ;;  %s1805_s11 = sld [smem:[#allocation6 + $0x13]]  ;;  %v293_v29 = vmul.f32 %v291_v27, %v1742_v0  ;;  %v295_v30 = vstv %s1790_s7 }
  0x1e   :  { %s1809_s1 = sld [smem:[#allocation6 + $0x11]]  ;;  %v297_v32 = vmul.f32 %v1757_v3, %v295_v30  ;;  %v301_v33 = vstv %s1793_s0  ;;  %v292_v48 = vmul.f32 %v291_v27, %v1747_v1  ;;  %v296_v49 = vmul.f32 %v1752_v2, %v295_v30 }
  0x1f   :  { %v103_v25 = vadd.f32 %v101_v19, %v97_v22  ;;  %v102_v26 = vadd.f32 %v100_v20, %v96_v24  ;;  %v303_v34 = vmul.f32 %v1769_v5, %v301_v33  ;;  %v307_v35 = vstv %s1795_s8  ;;  %s1815_s12 = sld [smem:[#allocation2 + $0x8]] }
  0x20   :  { %v299_v36 = vadd.f32 %v297_v32, %v293_v29  ;;  %v309_v37 = vmul.f32 %v1774_v7, %v307_v35  ;;  %s1818_s3 = sld [smem:[#allocation2 + $0x9]]  ;;  %v221_v39 = vstv %s1798_s9  ;;  %v298_v58 = vadd.f32 %v296_v49, %v292_v48 }
  0x21   :  { %v107_v28 = vadd.f32 %v105_v23, %v103_v25  ;;  %v106_v31 = vadd.f32 %v105_v23, %v102_v26  ;;  %s1820_s13 = sld [smem:[#allocation2 + $0xa]]  ;;  %v137_v40 = vstv %s1800_s2  ;;  %v302_v59 = vmul.f32 %v1764_v4, %v301_v33 }
  0x22   :  { %v305_v38 = vadd.f32 %v303_v34, %v299_v36  ;;  %v313_v42 = vstv %s1803_s10  ;;  %s1825_s14 = sld [smem:[#allocation2 + $0xb]]  ;;  %v308_v9 = vmul.f32 %v1781_v11, %v307_v35 }
  0x23   :  { %1606 = vtanh.f32 %v107_v28  ;;  %s1829_s15 = sld [smem:[#allocation6 + $0x15]]  ;;  %v263_v55 = vstv %s1805_s11  ;;  %v304_v8 = vadd.f32 %v302_v59, %v298_v58 }
  0x24   :  { %1608 = vtanh.f32 %v106_v31  ;;  %v311_v41 = vadd.f32 %v309_v37, %v305_v38  ;;  %v179_v56 = vstv %s1809_s1  ;;  %s1849_s17 = sld [smem:[#allocation6 + $0x16]] }
  0x25   :  { %v505_v44 = vstv %s1815_s12  ;;  %s1859_s18 = sld [smem:[#allocation4 + $0x2]]  ;;  %v310_v14 = vadd.f32 %v308_v9, %v304_v8 }
  0x26   :  { %v315_v51 = vadd.f32 %v313_v42, %v311_v41  ;;  %v507_v52 = vmul.f32 %v505_v44, %v1742_v0  ;;  %v509_v53 = vstv %s1818_s3  ;;  %s1870_s21 = sld [smem:[#allocation6 + $0x17]]  ;;  %v506_v32 = vmul.f32 %v505_v44, %v1747_v1 }
  0x27   :  { %v515_v54 = vstv %s1820_s13  ;;  %v511_v57 = vmul.f32 %v1757_v3, %v509_v53  ;;  %s1873_s22 = sld [smem:[#allocation6 + $0x18]]  ;;  %v314_v19 = vadd.f32 %v313_v42, %v310_v14  ;;  %v510_v33 = vmul.f32 %v1752_v2, %v509_v53 }
  0x28   :  { %1610 = vtanh.f32 %v315_v51  ;;  %v517_v61 = vmul.f32 %v1769_v5, %v515_v54  ;;  %v521_v0 = vstv %s1825_s14  ;;  %s1882_s23 = sld [smem:[#allocation6 + $0x1a]]  ;;  %v516_v1 = vmul.f32 %v1764_v4, %v515_v54 }
  0x29   :  { %v1827_v43 = vpop.eup %1606  ;;  %v513_v60 = vadd.f32 %v511_v57, %v507_v52  ;;  %v351_v6 = vstv %s1829_s15  ;;  %v523_v12 = vmul.f32 %v1774_v7, %v521_v0  ;;  %1612 = vtanh.f32 %v314_v19  ;;  %s1893_s24 = sld [smem:[#allocation6 + $0x1b]] }
  0x2a   :  { %v1832_v45 = vpop.eup %1608  ;;  %v223_v46 = vmul.f32 %v1827_v43, %v221_v39  ;;  %v139_v47 = vmul.f32 %v1827_v43, %v137_v40  ;;  %v265_v62 = vmul.f32 %v1827_v43, %v263_v55  ;;  %v181_v63 = vmul.f32 %v1827_v43, %v179_v56  ;;  %s1898_s25 = sld [smem:[#allocation6 + $0x1]] }
  0x2b   :  { %v138_v50 = vmul.f32 %v1832_v45, %v137_v40  ;;  %v519_v10 = vadd.f32 %v517_v61, %v513_v60  ;;  %v393_v13 = vstv %s1849_s17  ;;  %v180_v16 = vmul.f32 %v1832_v45, %v179_v56  ;;  %s1910_s26 = sld [smem:[#allocation6 + $0x1c]] }
  0x2c   :  { %228 = vrot.lane.b32.xlu1 %v223_v46, %s1688_s4  ;;  %144 = vrot.lane.b32.xlu0 %v139_v47, %s1689_s16  ;;  %v527_v17 = vstv %s1859_s18  ;;  %v222_v18 = vmul.f32 %v1832_v45, %v221_v39  ;;  %v435_v21 = vstv %s1870_s21  ;;  %v264_v23 = vmul.f32 %v1832_v45, %v263_v55  ;;  %s1914_s27 = sld [smem:[#allocation6 + $0x2]] }
  0x2d   :  { %142 = vrot.lane.b32.xlu2 %v138_v50, %s1689_s16  ;;  %v525_v15 = vadd.f32 %v523_v12, %v519_v10  ;;  %v477_v22 = vstv %s1873_s22  ;;  %v512_v36 = vadd.f32 %v510_v33, %v506_v32  ;;  %v522_v40 = vmul.f32 %v1781_v11, %v521_v0  ;;  %s1926_s28 = sld [smem:[#allocation6 + $0x1d]] }
  0x2e   :  { %v1863_v3 = vpop.eup %1610  ;;  %v565_v28 = vstv %s1882_s23  ;;  %s1930_s29 = sld [smem:[#allocation6 + $0x3]] }
  0x2f   :  { %v353_v5 = vmul.f32 %v1863_v3, %v351_v6  ;;  %v395_v7 = vmul.f32 %v1863_v3, %v393_v13  ;;  %v529_v20 = vadd.f32 %v527_v17, %v525_v15  ;;  %v437_v24 = vmul.f32 %v1863_v3, %v435_v21  ;;  %v1889_v26 = vpop.eup %1612  ;;  %s1933_s30 = sld [smem:[#allocation6 + $0x4]] }
  0x30   :  { %v479_v25 = vmul.f32 %v1863_v3, %v477_v22  ;;  %v352_v30 = vmul.f32 %v1889_v26, %v351_v6  ;;  %v394_v31 = vmul.f32 %v1889_v26, %v393_v13  ;;  %v607_v34 = vstv %s1893_s24  ;;  %s1951_s7 = sld [smem:[#allocation6 + $0x6]] }
  0x31   :  { %1614 = vtanh.f32 %v529_v20  ;;  %v123_v35 = vstv %s1898_s25  ;;  %v436_v38 = vmul.f32 %v1889_v26, %v435_v21  ;;  %v518_v39 = vadd.f32 %v516_v1, %v512_v36  ;;  %s1551_s0 = sld [smem:[#allocation6 + $0x7]] }
  0x32   :  { %v124_v37 = vmul.f32 %v1832_v45, %v123_v35  ;;  %v649_v41 = vstv %s1910_s26  ;;  %v165_v42 = vstv %s1914_s27  ;;  %v478_v46 = vmul.f32 %v1889_v26, %v477_v22  ;;  %s1966_s8 = sld [smem:[#allocation6 + $0x8]] }
  0x33   :  { %v524_v4 = vadd.f32 %v522_v40, %v518_v39  ;;  %v166_v44 = vmul.f32 %v1832_v45, %v165_v42  ;;  %v691_v48 = vstv %s1926_s28  ;;  %v125_v56 = vmul.f32 %v1827_v43, %v123_v35  ;;  %s1969_s9 = sld [smem:[#allocation6 + $0x9]] }
  0x34   :  { %270 = vrot.lane.b32.xlu1 %v265_v62, %s1690_s19  ;;  %186 = vrot.lane.b32.xlu0 %v181_v63, %s1691_s20  ;;  %v207_v49 = vstv %s1930_s29  ;;  %v167_v59 = vmul.f32 %v1827_v43, %v165_v42  ;;  %s1979_s2 = sld [smem:[#allocation6 + $0xb]] }
  0x35   :  { %358 = vrot.lane.b32.xlu2 %v353_v5, %s1689_s16  ;;  %v528_v47 = vadd.f32 %v527_v17, %v524_v4  ;;  %v249_v50 = vstv %s1933_s30  ;;  %v208_v52 = vmul.f32 %v1832_v45, %v207_v49  ;;  %v209_v63 = vmul.f32 %v1827_v43, %v207_v49  ;;  %s1986_s10 = sld [smem:[#allocation6 + $0xc]] }
  0x36   :  { %v250_v53 = vmul.f32 %v1832_v45, %v249_v50  ;;  %v337_v58 = vstv %s1951_s7  ;;  %v251_v10 = vmul.f32 %v1827_v43, %v249_v50  ;;  %s1997_s11 = sld [smem:[#allocation6 + $0xd]] }
  0x37   :  { %v1895_v27 = vpop.eup %1614  ;;  %1616 = vtanh.f32 %v528_v47  ;;  %v338_v60 = vmul.f32 %v1889_v26, %v337_v58  ;;  %v379_v62 = vstv %s1551_s0  ;;  %v339_v15 = vmul.f32 %v1863_v3, %v337_v58  ;;  %s2000_s1 = sld [smem:[#allocation6 + $0x1f]] }
  0x38   :  { %v567_v29 = vmul.f32 %v1895_v27, %v565_v28  ;;  %v609_v2 = vmul.f32 %v1895_v27, %v607_v34  ;;  %v651_v11 = vmul.f32 %v1895_v27, %v649_v41  ;;  %v693_v51 = vmul.f32 %v1895_v27, %v691_v48  ;;  %s2003_s12 = sld [smem:[#allocation6 + $0xe]] }
  0x39   :  { %v380_v0 = vmul.f32 %v1889_v26, %v379_v62  ;;  %v421_v8 = vstv %s1966_s8  ;;  %v463_v9 = vstv %s1969_s9  ;;  %s2014_s3 = sld [smem:[#allocation6 + $0x20]] }
  0x3a   :  { %v422_v12 = vmul.f32 %v1889_v26, %v421_v8  ;;  %v464_v5 = vmul.f32 %v1889_v26, %v463_v9  ;;  %v551_v14 = vstv %s1979_s2  ;;  %v465_v21 = vmul.f32 %v1863_v3, %v463_v9  ;;  %s2018_s13 = sld [smem:[#allocation6 + $0x21]] }
  0x3b   :  { %v593_v17 = vstv %s1986_s10  ;;  %s2028_s14 = sld [smem:[#allocation6 + $0x22]]  ;;  %v553_v1 = vmul.f32 %v1895_v27, %v551_v14 }
  0x3c   :  { %400 = vrot.lane.b32.xlu1 %v395_v7, %s1691_s20  ;;  %184 = vrot.lane.b32.xlu0 %v180_v16, %s1691_s20  ;;  %v381_v7 = vmul.f32 %v1863_v3, %v379_v62  ;;  %v635_v22 = vstv %s1997_s11  ;;  %s2032_s15 = sld [smem:[#allocation6 + $0xf]] }
  0x3d   :  { %226 = vrot.lane.b32.xlu2 %v222_v18, %s1688_s4  ;;  %v1949_v54 = vpop.eup %1616  ;;  %v423_v18 = vmul.f32 %v1863_v3, %v421_v8  ;;  %s2052_s17 = sld [smem:[#allocation6 + $0x24]] }
  0x3e   :  { %v566_v55 = vmul.f32 %v1949_v54, %v565_v28  ;;  %v608_v57 = vmul.f32 %v1949_v54, %v607_v34  ;;  %v650_v61 = vmul.f32 %v1949_v54, %v649_v41  ;;  %v692_v6 = vmul.f32 %v1949_v54, %v691_v48  ;;  %s2054_s18 = sld [smem:[#allocation6 + $0x14]] }
  0x3f   :  { %v552_v16 = vmul.f32 %v1949_v54, %v551_v14  ;;  %v594_v20 = vmul.f32 %v1949_v54, %v593_v17  ;;  %v595_v41 = vmul.f32 %v1895_v27, %v593_v17  ;;  %s2057_s21 = sld [smem:[#allocation6 + $0x25]] }
  0x40   :  { %v235_v34 = vstv %s2018_s13  ;;  %s2067_s22 = sld [smem:[#allocation6 + $0x26]] }
  0x41   :  { %s2072_s23 = sld [smem:[#allocation6 + $0x27]] }
  0x42   :  { %v115_v40 = vstv %s2032_s15  ;;  %s2087_s24 = sld [smem:[#allocation6 + $0x29]] }
  0x43   :  { %v116_v9 = vmul.f32 %v1832_v45, %v115_v40  ;;  %s2089_s25 = sld [smem:[#allocation6 + $0x19]] }
  0x44   :  { %268 = vrot.lane.b32.xlu1 %v264_v23, %s1690_s19  ;;  %442 = vrot.lane.b32.xlu0 %v437_v24, %s1688_s4  ;;  %v151_v23 = vstv %s2000_s1  ;;  %v677_v24 = vstv %s2003_s12  ;;  %s2100_s26 = sld [smem:[#allocation6 + $0x2a]] }
  0x45   :  { %484 = vrot.lane.b32.xlu2 %v479_v25, %s1690_s19  ;;  %v636_v25 = vmul.f32 %v1949_v54, %v635_v22  ;;  %v153_v49 = vmul.f32 %v1827_v43, %v151_v23  ;;  %s2115_s27 = sld [smem:[#allocation6 + $0x2b]] }
  0x46   :  { %s2118_s28 = sld [smem:[#allocation6 + $0x2c]] }
  0x47   :  { %s2121_s29 = sld [smem:[#allocation7 + $0x1]] }
  0x48   :  { %s2140_s30 = sld [smem:[#allocation6]] }
  0x49   :  { %s2154_s7 = sld [smem:[#allocation6 + $0x5]] }
  0x4a   :  { %s2172_s0 = sld [smem:[#allocation6 + $0xa]] }
  0x4b   :  { %s2188_s8 = sld [smem:[#allocation6 + $0x1e]] }
  0x4c   :  { %572 = vrot.lane.b32.xlu1 %v567_v29, %s1689_s16  ;;  %356 = vrot.lane.b32.xlu0 %v352_v30, %s1689_s16  ;;  %v152_v29 = vmul.f32 %v1832_v45, %v151_v23  ;;  %v678_v30 = vmul.f32 %v1949_v54, %v677_v24  ;;  %s2198_s9 = sld [smem:[#allocation6 + $0x23]] }
  0x4d   :  { %398 = vrot.lane.b32.xlu2 %v394_v31, %s1691_s20  ;;  %v193_v31 = vstv %s2014_s3  ;;  %s2236_s13 = sld [smem:[#allocation6 + $0x28]] }
  0x4e   :  { %v194_v35 = vmul.f32 %v1832_v45, %v193_v31 }
  0x54   :  { %614 = vrot.lane.b32.xlu0 %v609_v2, %s1691_s20  ;;  %128 = vrot.lane.b32.xlu1 %v124_v37, %s1689_s16  ;;  %v236_v2 = vmul.f32 %v1832_v45, %v235_v34  ;;  %v277_v37 = vstv %s2028_s14 }
  0x55   :  { %440 = vrot.lane.b32.xlu2 %v436_v38, %s1688_s4  ;;  %v278_v4 = vmul.f32 %v1832_v45, %v277_v37 }
  0x5c   :  { %656 = vrot.lane.b32.xlu0 %v651_v11, %s1688_s4  ;;  %170 = vrot.lane.b32.xlu1 %v166_v44, %s1691_s20  ;;  %v637_v11 = vmul.f32 %v1895_v27, %v635_v22  ;;  %v117_v44 = vmul.f32 %v1827_v43, %v115_v40 }
  0x5d   :  { %482 = vrot.lane.b32.xlu2 %v478_v46, %s1690_s19 }
  0x64   :  { %698 = vrot.lane.b32.xlu0 %v693_v51, %s1690_s19  ;;  %212 = vrot.lane.b32.xlu1 %v208_v52, %s1688_s4  ;;  %v679_v51 = vmul.f32 %v1895_v27, %v677_v24 }
  0x65   :  { %254 = vrot.lane.b32.xlu2 %v250_v53, %s1690_s19  ;;  %v195_v53 = vmul.f32 %v1827_v43, %v193_v31  ;;  %v579_v31 = vstv %s2087_s24 }
  0x6c   :  { %570 = vrot.lane.b32.xlu0 %v566_v55, %s1689_s16  ;;  %130 = vrot.lane.b32.xlu1 %v125_v56, %s1689_s16  ;;  %v365_v56 = vstv %s2052_s17  ;;  %s2254_s17 = sld [smem:[#allocation7 + $0x2]] }
  0x6d   :  { %612 = vrot.lane.b32.xlu2 %v608_v57, %s1691_s20  ;;  %v325_v57 = vstv %s2054_s18 }
  0x74   :  { %172 = vrot.lane.b32.xlu0 %v167_v59, %s1691_s20  ;;  %342 = vrot.lane.b32.xlu1 %v338_v60, %s1689_s16  ;;  %v407_v60 = vstv %s2057_s21 }
  0x75   :  { %654 = vrot.lane.b32.xlu2 %v650_v61, %s1688_s4  ;;  %v366_v61 = vmul.f32 %v1889_v26, %v365_v56  ;;  %v408_v8 = vmul.f32 %v1889_v26, %v407_v60 }
  0x7c   :  { %214 = vrot.lane.b32.xlu0 %v209_v63, %s1688_s4  ;;  %384 = vrot.lane.b32.xlu1 %v380_v0, %s1691_s20  ;;  %v237_v63 = vmul.f32 %v1827_v43, %v235_v34 }
  0x7d   :  { %696 = vrot.lane.b32.xlu2 %v692_v6, %s1690_s19  ;;  %v327_v6 = vmul.f32 %v1863_v3, %v325_v57 }
  0x84   :  { %256 = vrot.lane.b32.xlu0 %v251_v10, %s1690_s19  ;;  %426 = vrot.lane.b32.xlu1 %v422_v12, %s1688_s4  ;;  %v449_v12 = vstv %s2067_s22 }
  0x85   :  { %468 = vrot.lane.b32.xlu2 %v464_v5, %s1690_s19 }
  0x87   :  { %v1989_v13 = vpop.permute.xlu2 %142 }
  0x8c   :  { %344 = vrot.lane.b32.xlu0 %v339_v15, %s1689_s16  ;;  %386 = vrot.lane.b32.xlu1 %v381_v7, %s1691_s20  ;;  %v148_v15 = vadd.f32 %v1989_v13, %v116_v9  ;;  %v491_v7 = vstv %s2072_s23 }
  0x8d   :  { %556 = vrot.lane.b32.xlu2 %v552_v16, %s1689_s16  ;;  %v279_v16 = vmul.f32 %v1827_v43, %v277_v37  ;;  %v492_v22 = vmul.f32 %v1889_v26, %v491_v7 }
  0x8f   :  { %v2006_v19 = vpop.permute.xlu2 %358 }
  0x94   :  { %428 = vrot.lane.b32.xlu0 %v423_v18, %s1688_s4  ;;  %598 = vrot.lane.b32.xlu1 %v594_v20, %s1691_s20  ;;  %v450_v18 = vmul.f32 %v1889_v26, %v449_v12 }
  0x95   :  { %470 = vrot.lane.b32.xlu2 %v465_v21, %s1690_s19 }
  0x97   :  { %v2021_v28 = vpop.permute.xlu2 %226 }
  0x9c   :  { %640 = vrot.lane.b32.xlu0 %v636_v25, %s1688_s4  ;;  %156 = vrot.lane.b32.xlu1 %v152_v29, %s1689_s16 }
  0x9d   :  { %682 = vrot.lane.b32.xlu2 %v678_v30, %s1690_s19  ;;  %v326_v30 = vmul.f32 %v1889_v26, %v325_v57 }
  0x9e   :  { %v229_v32 = vpop.permute.xlu1 %228  ;;  %v145_v33 = vpop.permute.xlu0 %144 }
  0x9f   :  { %v2035_v36 = vpop.permute.xlu2 %484  ;;  %v149_v48 = vadd.f32 %v145_v33, %v117_v44  ;;  %v367_v33 = vmul.f32 %v1863_v3, %v365_v56  ;;  %v755_v56 = vstv %s2121_s29 }
  0xa4   :  { %198 = vrot.lane.b32.xlu0 %v194_v35, %s1691_s20  ;;  %558 = vrot.lane.b32.xlu1 %v553_v1, %s1689_s16  ;;  %v409_v35 = vmul.f32 %v1863_v3, %v407_v60 }
  0xa5   :  { %240 = vrot.lane.b32.xlu2 %v236_v2, %s1688_s4 }
  0xa6   :  { %v271_v38 = vpop.permute.xlu1 %270  ;;  %v187_v39 = vpop.permute.xlu0 %186 }
  0xa7   :  { %v2045_v42 = vpop.permute.xlu2 %398  ;;  %v191_v52 = vadd.f32 %v187_v39, %v149_v48  ;;  %v621_v39 = vstv %s2100_s26  ;;  %v493_v48 = vmul.f32 %v1863_v3, %v491_v7 }
  0xa8   :  { %v622_v44 = vmul.f32 %v1949_v54, %v621_v39 }
  0xa9   :  { %v233_v55 = vadd.f32 %v229_v32, %v191_v52  ;;  %v539_v32 = vstv %s2089_s25 }
  0xaa   :  { %v541_v2 = vmul.f32 %v1895_v27, %v539_v32 }
  0xab   :  { %v275_v0 = vadd.f32 %v271_v38, %v233_v55  ;;  %v705_v55 = vstv %s2118_s28 }
  0xac   :  { %600 = vrot.lane.b32.xlu0 %v595_v41, %s1691_s20  ;;  %282 = vrot.lane.b32.xlu1 %v278_v4, %s1690_s19  ;;  %v451_v4 = vmul.f32 %v1863_v3, %v449_v12  ;;  %v581_v12 = vmul.f32 %v1895_v27, %v579_v31 }
  0xad   :  { %642 = vrot.lane.b32.xlu2 %v637_v11, %s1688_s4  ;;  %v329_v10 = vadd.f32 %v327_v6, %v275_v0  ;;  %v540_v0 = vmul.f32 %v1949_v54, %v539_v32 }
  0xae   :  { %v401_v46 = vpop.permute.xlu1 %400  ;;  %v185_v47 = vpop.permute.xlu0 %184 }
  0xaf   :  { %v2060_v50 = vpop.permute.xlu2 %440  ;;  %v363_v20 = vadd.f32 %v2006_v19, %v329_v10  ;;  %v190_v21 = vadd.f32 %v185_v47, %v148_v15 }
  0xb1   :  { %v405_v13 = vadd.f32 %v401_v46, %v363_v20  ;;  %v232_v23 = vadd.f32 %v2021_v28, %v190_v21  ;;  %v580_v28 = vmul.f32 %v1949_v54, %v579_v31  ;;  %v623_v21 = vmul.f32 %v1895_v27, %v621_v39 }
  0xb2   :  { %v707_v31 = vmul.f32 %v1895_v27, %v705_v55 }
  0xb4   :  { %158 = vrot.lane.b32.xlu0 %v153_v49, %s1689_s16  ;;  %684 = vrot.lane.b32.xlu1 %v679_v51, %s1690_s19 }
  0xb5   :  { %200 = vrot.lane.b32.xlu2 %v195_v53, %s1691_s20  ;;  %v663_v53 = vstv %s2115_s27 }
  0xb6   :  { %v269_v58 = vpop.permute.xlu1 %268  ;;  %v443_v59 = vpop.permute.xlu0 %442 }
  0xb7   :  { %v2075_v62 = vpop.permute.xlu2 %482  ;;  %v274_v29 = vadd.f32 %v269_v58, %v232_v23  ;;  %v447_v19 = vadd.f32 %v443_v59, %v405_v13  ;;  %v665_v13 = vmul.f32 %v1895_v27, %v663_v53 }
  0xb9   :  { %v489_v1 = vadd.f32 %v2035_v36, %v447_v19  ;;  %v328_v37 = vadd.f32 %v326_v30, %v274_v29 }
  0xbb   :  { %v543_v36 = vadd.f32 %v541_v2, %v489_v1 }
  0xbc   :  { %370 = vrot.lane.b32.xlu0 %v366_v61, %s1689_s16  ;;  %242 = vrot.lane.b32.xlu1 %v237_v63, %s1688_s4  ;;  %v706_v61 = vmul.f32 %v1949_v54, %v705_v55 }
  0xbd   :  { %412 = vrot.lane.b32.xlu2 %v408_v8, %s1691_s20 }
  0xbe   :  { %v573_v5 = vpop.permute.xlu1 %572  ;;  %v357_v14 = vpop.permute.xlu0 %356 }
  0xbf   :  { %v2092_v17 = vpop.permute.xlu2 %254  ;;  %v362_v38 = vadd.f32 %v357_v14, %v328_v37  ;;  %v577_v46 = vadd.f32 %v573_v5, %v543_v36 }
  0xc1   :  { %v404_v47 = vadd.f32 %v2045_v42, %v362_v38  ;;  %v664_v42 = vmul.f32 %v1949_v54, %v663_v53 }
  0xc3   :  { %v446_v51 = vadd.f32 %v2060_v50, %v404_v47 }
  0xc4   :  { %284 = vrot.lane.b32.xlu0 %v279_v16, %s1690_s19  ;;  %454 = vrot.lane.b32.xlu1 %v450_v18, %s1688_s4  ;;  %v111_v16 = vstv %s2140_s30 }
  0xc5   :  { %496 = vrot.lane.b32.xlu2 %v492_v22, %s1690_s19  ;;  %v488_v6 = vadd.f32 %v2075_v62, %v446_v51  ;;  %v112_v23 = vmul.f32 %v1832_v45, %v111_v16 }
  0xc6   :  { %v615_v24 = vpop.permute.xlu0 %614  ;;  %v2102_v25 = vpop.permute.xlu1 %128 }
  0xc7   :  { %v613_v34 = vpop.permute.xlu2 %612  ;;  %v619_v49 = vadd.f32 %v615_v24, %v577_v46  ;;  %v542_v50 = vadd.f32 %v540_v0, %v488_v6  ;;  %v134_v29 = vadd.f32 %v2102_v25, %v112_v23 }
  0xcc   :  { %372 = vrot.lane.b32.xlu0 %v367_v33, %s1689_s16  ;;  %414 = vrot.lane.b32.xlu1 %v409_v35, %s1691_s20  ;;  %v319_v35 = vstv %s2154_s7 }
  0xcd   :  { %584 = vrot.lane.b32.xlu2 %v580_v28, %s1689_s16  ;;  %v320_v1 = vmul.f32 %v1889_v26, %v319_v35 }
  0xce   :  { %v657_v40 = vpop.permute.xlu0 %656  ;;  %v171_v41 = vpop.permute.xlu1 %170 }
  0xcf   :  { %v655_v11 = vpop.permute.xlu2 %654  ;;  %v661_v52 = vadd.f32 %v657_v40, %v619_v49  ;;  %v176_v32 = vadd.f32 %v171_v41, %v134_v29 }
  0xd4   :  { %456 = vrot.lane.b32.xlu0 %v451_v4, %s1688_s4  ;;  %626 = vrot.lane.b32.xlu1 %v622_v44, %s1691_s20 }
  0xd5   :  { %498 = vrot.lane.b32.xlu2 %v493_v48, %s1690_s19 }
  0xd6   :  { %v699_v57 = vpop.permute.xlu0 %698  ;;  %v213_v58 = vpop.permute.xlu1 %212 }
  0xd7   :  { %v703_v59 = vadd.f32 %v699_v57, %v661_v52  ;;  %v697_v60 = vpop.permute.xlu2 %696  ;;  %v218_v33 = vadd.f32 %v213_v58, %v176_v32  ;;  %v321_v58 = vmul.f32 %v1863_v3, %v319_v35 }
  0xd9   :  { %v757_v63 = vadd.f32 %v755_v56, %v703_v59  ;;  %v260_v25 = vadd.f32 %v2092_v17, %v218_v33  ;;  %v533_v17 = vstv %s2172_s0 }
  0xda   :  { %v534_v48 = vmul.f32 %v1949_v54, %v533_v17 }
  0xdb   :  { %1618 = vtanh.f32 %v757_v63  ;;  %v322_v38 = vadd.f32 %v320_v1, %v260_v25 }
  0xdc   :  { %668 = vrot.lane.b32.xlu0 %v664_v42, %s1688_s4  ;;  %710 = vrot.lane.b32.xlu1 %v706_v61, %s1690_s19 }
  0xde   :  { %v571_v8 = vpop.permute.xlu0 %570  ;;  %v131_v9 = vpop.permute.xlu1 %130 }
  0xdf   :  { %v576_v10 = vadd.f32 %v571_v8, %v542_v50  ;;  %v469_v5 = vpop.permute.xlu2 %468 }
  0xe1   :  { %v2143_v14 = vpop.eup %1618  ;;  %v618_v15 = vadd.f32 %v613_v34, %v576_v10 }
  0xe2   :  { %764 = vrot.lane.b32.xlu2 %v2143_v14, %s1689_s16 }
  0xe3   :  { %v660_v62 = vadd.f32 %v655_v11, %v618_v15  ;;  %v113_v11 = vmul.f32 %v1827_v43, %v111_v16 }
  0xe4   :  { %586 = vrot.lane.b32.xlu0 %v581_v12, %s1689_s16  ;;  %772 = vrot.lane.b32.xlu1 %v2143_v14, %s1691_s20 }
  0xe5   :  { %v702_v7 = vadd.f32 %v697_v60, %v660_v62  ;;  %v135_v46 = vadd.f32 %v131_v9, %v113_v11 }
  0xe6   :  { %v173_v18 = vpop.permute.xlu0 %172  ;;  %v343_v20 = vpop.permute.xlu1 %342 }
  0xe7   :  { %v557_v22 = vpop.permute.xlu2 %556  ;;  %v756_v24 = vadd.f32 %v755_v56, %v702_v7  ;;  %v348_v39 = vadd.f32 %v343_v20, %v322_v38  ;;  %v177_v49 = vadd.f32 %v173_v18, %v135_v46  ;;  %v535_v18 = vmul.f32 %v1895_v27, %v533_v17  ;;  %v1583_v17 = vld [vmem:[%s2353_s5 + $0x30] sm:$0xff] }
  0xe9   :  { %1620 = vtanh.f32 %v756_v24 }
  0xea   :  { %628 = vrot.lane.b32.xlu2 %v623_v21, %s1691_s20 }
  0xec   :  { %780 = vrot.lane.b32.xlu0 %v2143_v14, %s1688_s4  ;;  %670 = vrot.lane.b32.xlu1 %v665_v13, %s1688_s4 }
  0xee   :  { %v215_v19 = vpop.permute.xlu0 %214  ;;  %v385_v30 = vpop.permute.xlu1 %384 }
  0xef   :  { %v471_v34 = vpop.permute.xlu2 %470  ;;  %v2164_v28 = vpop.eup %1620  ;;  %v390_v41 = vadd.f32 %v385_v30, %v348_v39  ;;  %v219_v55 = vadd.f32 %v215_v19, %v177_v49  ;;  %v119_v19 = vstv %s2188_s8  ;;  %v331_v39 = vstv %s2198_s9 }
  0xf0   :  { %v120_v33 = vmul.f32 %v1832_v45, %v119_v19  ;;  %v1584_v45 = vld [vmem:[%s2353_s5 + $0x38] sm:$0x1]  ;;  %v2226_v49 = vand.u32 4294901760, %v1583_v17 }
  0xf1   :  { %v800_v11 = vsel %vm798_vm0, %v1584_v45, 0  ;;  %v1244_v45 = vstv %s2254_s17 }
  0xf2   :  { %712 = vrot.lane.b32.xlu2 %v707_v31, %s1690_s19  ;;  %s2179_s19 = sld [smem:[#allocation7]] }
  0xf4   :  { %770 = vrot.lane.b32.xlu1 %v2164_v28, %s1691_s20  ;;  %762 = vrot.lane.b32.xlu0 %v2164_v28, %s1689_s16 }
  0xf6   :  { %v257_v2 = vpop.permute.xlu0 %256  ;;  %v427_v37 = vpop.permute.xlu1 %426 }
  0xf7   :  { %v683_v40 = vpop.permute.xlu2 %682  ;;  %v432_v44 = vadd.f32 %v427_v37, %v390_v41  ;;  %v261_v57 = vadd.f32 %v257_v2, %v219_v55 }
  0xf8   :  { %v719_v8 = vstv %s2179_s19 }
  0xf9   :  { %v474_v47 = vadd.f32 %v469_v5, %v432_v44  ;;  %v323_v42 = vadd.f32 %v321_v58, %v261_v57  ;;  %v2220_v44 = vand.u32 4294901760, %v800_v11 }
  0xfa   :  { %778 = vrot.lane.b32.xlu2 %v2164_v28, %s1688_s4 }
  0xfb   :  { %v536_v56 = vadd.f32 %v534_v48, %v474_v47  ;;  %v852_v48 = vsub.f32 %v800_v11, %v2220_v44  ;;  %1590 = vmatpush.msra.mxu2 %v2220_v44  ;;  %815 = vmatpush.msra.mxu0 %v2220_v44 }
  0xfd   :  { %v562_v59 = vadd.f32 %v557_v22, %v536_v56  ;;  %v853_v55 = vand.u32 4294901760, %v852_v48  ;;  %v858_v56 = vsub.f32 %v1583_v17, %v2226_v49  ;;  %1591 = vmatpush.msra.mxu2 %v2226_v49  ;;  %817 = vmatpush.msra.mxu0 %v2226_v49 }
  0xfe   :  { %v345_v36 = vpop.permute.xlu0 %344  ;;  %v387_v4 = vpop.permute.xlu1 %386 }
  0xff   :  { %v241_v51 = vpop.permute.xlu2 %240  ;;  %v349_v0 = vadd.f32 %v345_v36, %v323_v42  ;;  %v859_v42 = vand.u32 4294901760, %v858_v56 }
 0x101   :  { %v391_v10 = vadd.f32 %v387_v4, %v349_v0  ;;  %v332_v4 = vmul.f32 %v1889_v26, %v331_v39  ;;  %v121_v26 = vmul.f32 %v1827_v43, %v119_v19  ;;  %v1581_v43 = vld [vmem:[%s2353_s5 + $0x20] sm:$0xff] }
 0x106   :  { %v429_v52 = vpop.permute.xlu0 %428  ;;  %v599_v53 = vpop.permute.xlu1 %598 }
 0x107   :  { %v604_v60 = vadd.f32 %v599_v53, %v562_v59  ;;  %v643_v6 = vpop.permute.xlu2 %642  ;;  %v433_v5 = vadd.f32 %v429_v52, %v391_v10  ;;  %v1582_v53 = vld [vmem:[%s2353_s5 + $0x28] sm:$0xff]  ;;  %v854_v59 = vsub.f32 %v852_v48, %v853_v55 }
 0x108   :  { %v818_v57 = vand.u32 4294901760, %v1582_v53 }
 0x109   :  { %v475_v7 = vadd.f32 %v471_v34, %v433_v5  ;;  %v855_v0 = vand.u32 4294901760, %v854_v59 }
 0x10a   :  { %1592 = vmatpush.msra.mxu2 %v818_v57  ;;  %819 = vmatpush.msra.mxu0 %v818_v57 }
 0x10b   :  { %v537_v21 = vadd.f32 %v535_v18, %v475_v7  ;;  %1594 = vmatpush.msra.mxu3 %v855_v0  ;;  %856 = vmatpush.msra.mxu1 %v855_v0 }
 0x10e   :  { %v641_v61 = vpop.permute.xlu0 %640  ;;  %v157_v63 = vpop.permute.xlu1 %156 }
 0x10f   :  { %v646_v50 = vadd.f32 %v641_v61, %v604_v60  ;;  %v2183_v16 = vpop.permute.xlu2 %200  ;;  %v162_v25 = vadd.f32 %v157_v63, %v120_v33  ;;  %v864_v60 = vsub.f32 %v1582_v53, %v818_v57  ;;  %v820_v61 = vand.u32 4294901760, %v1581_v43 }
 0x111   :  { %v688_v9 = vadd.f32 %v683_v40, %v646_v50  ;;  %v865_v50 = vand.u32 4294901760, %v864_v60  ;;  %1593 = vmatpush.msra.mxu2 %v820_v61  ;;  %821 = vmatpush.msra.mxu0 %v820_v61 }
 0x113   :  { %v720_v12 = vadd.f32 %v719_v8, %v688_v9  ;;  %898 = vmatpush.msrb.mxu2 %v852_v48  ;;  %967 = vmatpush.msrb.mxu0 %v853_v55 }
 0x115   :  { %1622 = vtanh.f32 %v720_v12  ;;  %901 = vmatpush.msrb.mxu2 %v858_v56  ;;  %971 = vmatpush.msrb.mxu0 %v859_v42 }
 0x116   :  { %v199_v15 = vpop.permute.xlu0 %198  ;;  %v559_v62 = vpop.permute.xlu1 %558 }
 0x117   :  { %v563_v23 = vadd.f32 %v559_v62, %v537_v21  ;;  %v413_v29 = vpop.permute.xlu2 %412  ;;  %v204_v1 = vadd.f32 %v199_v15, %v162_v25  ;;  %v866_v15 = vsub.f32 %v864_v60, %v865_v50  ;;  %v545_v21 = vstv %s2236_s13  ;;  %904 = vmatpush.msrb.mxu2 %v864_v60  ;;  %975 = vmatpush.msrb.mxu0 %v865_v50 }
 0x119   :  { %v246_v41 = vadd.f32 %v241_v51, %v204_v1 }
 0x11b   :  { %v2186_v20 = vpop.eup %1622 }
 0x11c   :  { %742 = vrot.lane.b32.xlu2 %v2186_v20, %s1688_s4  ;;  %734 = vrot.lane.b32.xlu1 %v2186_v20, %s1691_s20 }
 0x11d   :  { %726 = vrot.lane.b32.xlu0 %v2186_v20, %s1689_s16 }
 0x11e   :  { %v601_v22 = vpop.permute.xlu0 %600  ;;  %v283_v13 = vpop.permute.xlu1 %282 }
 0x11f   :  { %v605_v24 = vadd.f32 %v601_v22, %v563_v23  ;;  %v2200_v2 = vpop.permute.xlu2 %496  ;;  %v288_v36 = vadd.f32 %v283_v13, %v246_v41  ;;  %v867_v22 = vand.u32 4294901760, %v866_v15 }
 0x121   :  { %v647_v30 = vadd.f32 %v643_v6, %v605_v24  ;;  %v334_v52 = vadd.f32 %v332_v4, %v288_v36  ;;  %v860_v6 = vsub.f32 %v858_v56, %v859_v42 }
 0x123   :  { %v861_v5 = vand.u32 4294901760, %v860_v6 }
 0x125   :  { %1595 = vmatpush.msra.mxu3 %v861_v5  ;;  %862 = vmatpush.msra.mxu1 %v861_v5  ;;  %v752_v5 = vld [vmem:[%s2353_s5 + $0x10] sm:$0xff] }
 0x126   :  { %v159_v31 = vpop.permute.xlu0 %158  ;;  %v685_v32 = vpop.permute.xlu1 %684 }
 0x127   :  { %v689_v34 = vadd.f32 %v685_v32, %v647_v30  ;;  %v2231_v51 = vpop.permute.xlu2 %584  ;;  %v163_v63 = vadd.f32 %v159_v31, %v121_v26  ;;  %1596 = vmatpush.msra.mxu3 %v867_v22  ;;  %868 = vmatpush.msra.mxu1 %v867_v22  ;;  %v546_v30 = vmul.f32 %v1949_v54, %v545_v21 }
 0x129   :  { %v721_v35 = vadd.f32 %v719_v8, %v689_v34  ;;  %v870_v8 = vsub.f32 %v1581_v43, %v820_v61  ;;  %v205_v62 = vadd.f32 %v2183_v16, %v163_v63 }
 0x12b   :  { %1624 = vtanh.f32 %v721_v35  ;;  %v871_v18 = vand.u32 4294901760, %v870_v8  ;;  %907 = vmatpush.msrb.mxu2 %v870_v8 }
 0x12d   :  { %v872_v24 = vsub.f32 %v870_v8, %v871_v18  ;;  %979 = vmatpush.msrb.mxu0 %v871_v18  ;;  %v1041_v18 = vand.u32 4294901760, %v752_v5 }
 0x12e   :  { %v371_v37 = vpop.permute.xlu0 %370  ;;  %v2202_v38 = vpop.permute.xlu1 %242 }
 0x12f   :  { %v376_v58 = vadd.f32 %v371_v37, %v334_v52  ;;  %v247_v13 = vadd.f32 %v2202_v38, %v205_v62  ;;  %v499_v23 = vpop.permute.xlu2 %498  ;;  %v873_v31 = vand.u32 4294901760, %v872_v24 }
 0x131   :  { %v2205_v40 = vpop.eup %1624  ;;  %v418_v9 = vadd.f32 %v413_v29, %v376_v58  ;;  %v333_v29 = vmul.f32 %v1863_v3, %v331_v39  ;;  %1597 = vmatpush.msra.mxu3 %v873_v31  ;;  %874 = vmatpush.msra.mxu1 %v873_v31 }
 0x132   :  { %744 = vrot.lane.b32.xlu2 %v2205_v40, %s1688_s4  ;;  %736 = vrot.lane.b32.xlu1 %v2205_v40, %s1691_s20 }
 0x133   :  { %728 = vrot.lane.b32.xlu0 %v2205_v40, %s1689_s16  ;;  %932 = vmatpush.msrb.mxu3 %v2220_v44 }
 0x134   :  { %1002 = vmatpush.msrb.mxu1 %v2220_v44  ;;  %v547_v44 = vmul.f32 %v1895_v27, %v545_v21 }
 0x135   :  { %934 = vmatpush.msrb.mxu3 %v2226_v49 }
 0x136   :  { %v285_v46 = vpop.permute.xlu0 %284  ;;  %v455_v47 = vpop.permute.xlu1 %454  ;;  %1004 = vmatpush.msrb.mxu1 %v2226_v49 }
 0x137   :  { %v460_v7 = vadd.f32 %v455_v47, %v418_v9  ;;  %v289_v16 = vadd.f32 %v285_v46, %v247_v13  ;;  %936 = vmatpush.msrb.mxu3 %v818_v57 }
 0x138   :  { %1006 = vmatpush.msrb.mxu1 %v818_v57 }
 0x139   :  { %v502_v19 = vadd.f32 %v2200_v2, %v460_v7  ;;  %v335_v34 = vadd.f32 %v333_v29, %v289_v16  ;;  %938 = vmatpush.msrb.mxu3 %v820_v61  ;;  %v750_v16 = vld [vmem:[%s2353_s5] sm:$0xff] }
 0x13a   :  { %1008 = vmatpush.msrb.mxu1 %v820_v61 }
 0x13b   :  { %v548_v3 = vadd.f32 %v546_v30, %v502_v19 }
 0x13c   :  { %v765_v35 = vpop.permute.xlu2 %764 }
 0x13d   :  { %v590_v25 = vadd.f32 %v2231_v51, %v548_v3  ;;  %v769_v51 = vmax.f32 %v2143_v14, %v765_v35  ;;  %v753_v14 = vld [vmem:[%s2353_s5 + $0x18] sm:$0x1] }
 0x13e   :  { %v373_v10 = vpop.permute.xlu0 %372  ;;  %v415_v12 = vpop.permute.xlu1 %414  ;;  %v1025_v60 = vsel %vm798_vm0, %v753_v14, 0 }
 0x13f   :  { %v377_v54 = vadd.f32 %v373_v10, %v335_v34  ;;  %v1039_v0 = vand.u32 4294901760, %v1025_v60 }
 0x141   :  { %v419_v1 = vadd.f32 %v415_v12, %v377_v54  ;;  %v1077_v7 = vsub.f32 %v1025_v60, %v1039_v0  ;;  %v1588_v60 = vld [vmem:[%s2353_s5 + $0x50] sm:$0xff] }
 0x143   :  { %v1078_v13 = vand.u32 4294901760, %v1077_v7 }
 0x144   :  { %v629_v17 = vpop.permute.xlu2 %628 }
 0x145   :  { %v1079_v30 = vsub.f32 %v1077_v7, %v1078_v13 }
 0x146   :  { %v457_v32 = vpop.permute.xlu0 %456  ;;  %v627_v33 = vpop.permute.xlu1 %626 }
 0x147   :  { %v632_v2 = vadd.f32 %v627_v33, %v590_v25  ;;  %v461_v39 = vadd.f32 %v457_v32, %v419_v1  ;;  %v1045_v33 = vand.u32 4294901760, %v750_v16  ;;  %v1080_v3 = vand.u32 4294901760, %v1079_v30 }
 0x149   :  { %v503_v4 = vadd.f32 %v499_v23, %v461_v39  ;;  %v1083_v23 = vsub.f32 %v752_v5, %v1041_v18  ;;  %v1095_v25 = vsub.f32 %v750_v16, %v1045_v33 }
 0x14b   :  { %v549_v48 = vadd.f32 %v547_v44, %v503_v4  ;;  %v1084_v31 = vand.u32 4294901760, %v1083_v23 }
 0x14c   :  { %v713_v58 = vpop.permute.xlu2 %712 }
 0x14d   :  { %v1085_v54 = vsub.f32 %v1083_v23, %v1084_v31 }
 0x14e   :  { %v669_v37 = vpop.permute.xlu0 %668  ;;  %v711_v38 = vpop.permute.xlu1 %710 }
 0x14f   :  { %v674_v41 = vadd.f32 %v669_v37, %v632_v2  ;;  %v1086_v2 = vand.u32 4294901760, %v1085_v54 }
 0x151   :  { %v716_v36 = vadd.f32 %v711_v38, %v674_v41  ;;  %v1096_v38 = vand.u32 4294901760, %v1095_v25 }
 0x153   :  { %v1245_v11 = vadd.f32 %v1244_v45, %v716_v36 }
 0x154   :  { %v779_v15 = vpop.permute.xlu2 %778 }
 0x155   :  { %1626 = vtanh.f32 %v1245_v11  ;;  %v1589_v11 = vld [vmem:[%s2353_s5 + $0x58] sm:$0x1] }
 0x156   :  { %v587_v46 = vpop.permute.xlu0 %586  ;;  %v773_v47 = vpop.permute.xlu1 %772  ;;  %v1287_v44 = vsel %vm798_vm0, %v1589_v11, 0 }
 0x157   :  { %v591_v49 = vadd.f32 %v587_v46, %v549_v48  ;;  %v777_v52 = vmax.f32 %v769_v51, %v773_v47 }
 0x159   :  { %v633_v27 = vadd.f32 %v629_v17, %v591_v49  ;;  %v2311_v17 = vand.u32 4294901760, %v1287_v44 }
 0x15b   :  { %v2261_v26 = vpop.eup %1626 }
 0x15c   :  { %1267 = vrot.lane.b32.xlu2 %v2261_v26, %s1688_s4  ;;  %1259 = vrot.lane.b32.xlu1 %v2261_v26, %s1691_s20 }
 0x15d   :  { %1251 = vrot.lane.b32.xlu0 %v2261_v26, %s1689_s16 }
 0x15e   :  { %v781_v53 = vpop.permute.xlu0 %780  ;;  %v671_v55 = vpop.permute.xlu1 %670 }
 0x15f   :  { %v785_v56 = vmax.f32 %v777_v52, %v781_v53  ;;  %v675_v57 = vadd.f32 %v671_v55, %v633_v27 }
 0x161   :  { %v796_v43 = vsel %vm791_vm1, %v785_v56, 0  ;;  %v717_v59 = vadd.f32 %v713_v58, %v675_v57 }
 0x162   :  { %v2274_v42 = vand.u32 4294901760, %v796_v43 }
 0x163   :  { %v1246_v61 = vadd.f32 %v1244_v45, %v717_v59  ;;  %v1097_v45 = vsub.f32 %v1095_v25, %v1096_v38 }
 0x164   :  { %v2278_v63 = vsub.f32 %v796_v43, %v2274_v42  ;;  %880 = vmatmul.f32.vlgmr.msra.gmra.mxu3 %v2274_v42 }
 0x165   :  { %1628 = vtanh.f32 %v1246_v61  ;;  %1081 = vmatpush.msra.mxu3 %v1080_v3  ;;  %v1098_v4 = vand.u32 4294901760, %v1097_v45 }
 0x166   :  { %v763_v6 = vpop.permute.xlu0 %762  ;;  %v832_v50 = vand.u32 4294901760, %v2278_v63  ;;  %v771_v9 = vpop.permute.xlu1 %770 }
 0x167   :  { %v768_v8 = vmax.f32 %v2164_v28, %v763_v6  ;;  %v751_v28 = vld [vmem:[%s2353_s5 + $0x8] sm:$0xff]  ;;  %1087 = vmatpush.msra.mxu3 %v1086_v2 }
 0x168   :  { %v833_v10 = vsub.f32 %v2278_v63, %v832_v50  ;;  %v1043_v24 = vand.u32 4294901760, %v751_v28  ;;  %v1587_v6 = vld [vmem:[%s2353_s5 + $0x48] sm:$0xff] }
 0x169   :  { %v776_v12 = vmax.f32 %v768_v8, %v771_v9 }
 0x16a   :  { %v834_v62 = vand.u32 4294901760, %v833_v10  ;;  %v1089_v32 = vsub.f32 %v751_v28, %v1043_v24 }
 0x16b   :  { %v2289_v21 = vpop.eup %1628  ;;  %v784_v22 = vmax.f32 %v776_v12, %v779_v15  ;;  %v1586_v12 = vld [vmem:[%s2353_s5 + $0x40] sm:$0xff] }
 0x16c   :  { %835 = vmatmul.f32.vlgmr.msra.gmra.mxu2 %v834_v62  ;;  %1269 = vrot.lane.b32.xlu2 %v2289_v21, %s1688_s4  ;;  %v1090_v35 = vand.u32 4294901760, %v1089_v32 }
 0x16d   :  { %v793_v29 = vsel %vm791_vm1, %v784_v22, 0  ;;  %1261 = vrot.lane.b32.xlu1 %v2289_v21, %s1691_s20  ;;  %1253 = vrot.lane.b32.xlu0 %v2289_v21, %s1689_s16 }
 0x16e   :  { %v822_v19 = vand.u32 4294901760, %v793_v29  ;;  %1040 = vmatpush.msra.mxu2 %v1039_v0  ;;  %v1091_v37 = vsub.f32 %v1089_v32, %v1090_v35 }
 0x170   :  { %876 = vmatmul.f32.vlgmr.msra.gmra.mxu1 %v822_v19  ;;  %v823_v34 = vsub.f32 %v793_v29, %v822_v19  ;;  %1042 = vmatpush.msra.mxu2 %v1041_v18  ;;  %v1092_v41 = vand.u32 4294901760, %v1091_v37 }
 0x171   :  { %1157 = vmatpush.msra.mxu1 %v1039_v0 }
 0x172   :  { %v824_v1 = vand.u32 4294901760, %v823_v34  ;;  %1044 = vmatpush.msra.mxu2 %v1043_v24  ;;  %1093 = vmatpush.msra.mxu3 %v1092_v41 }
 0x173   :  { %1159 = vmatpush.msra.mxu1 %v1041_v18 }
 0x174   :  { %910 = vmatmul.f32.vlgmr.msrb.gmra.mxu2 %v823_v34  ;;  %942 = vmatmul.f32.vlgmr.msrb.gmra.mxu3 %v824_v1  ;;  %v825_v39 = vsub.f32 %v823_v34, %v824_v1 }
 0x175   :  { %1161 = vmatpush.msra.mxu1 %v1043_v24  ;;  %1046 = vmatpush.msra.mxu2 %v1045_v33 }
 0x176   :  { %v826_v36 = vand.u32 4294901760, %v825_v39  ;;  %1099 = vmatpush.msra.mxu3 %v1098_v4  ;;  %v743_v51 = vpop.permute.xlu2 %742 }
 0x177   :  { %1163 = vmatpush.msra.mxu1 %v1045_v33  ;;  %1192 = vmatpush.msrb.mxu2 %v1078_v13 }
 0x178   :  { %827 = vmatmul.f32.vlgmr.msra.gmra.mxu0 %v826_v36  ;;  %1010 = vmatmul.f32.vlgmr.msrb.gmra.mxu1 %v822_v19 }
 0x179   :  { %1123 = vmatpush.msra.mxu0 %v1077_v7  ;;  %1227 = vmatpush.msrb.mxu3 %v1039_v0  ;;  %v1303_v0 = vand.u32 4294901760, %v1588_v60  ;;  %v1307_v7 = vand.u32 4294901760, %v1586_v12 }
 0x17a   :  { %1196 = vmatpush.msrb.mxu2 %v1084_v31 }
 0x17b   :  { %1126 = vmatpush.msra.mxu0 %v1083_v23  ;;  %1229 = vmatpush.msrb.mxu3 %v1041_v18  ;;  %v1345_v9 = vsub.f32 %v1588_v60, %v1303_v0  ;;  %v1357_v23 = vsub.f32 %v1586_v12, %v1307_v7 }
 0x17c   :  { %915 = vmatmul.f32.gmra.mxu2 %v2278_v63  ;;  %948 = vmatmul.f32.gmra.mxu3 %v832_v50  ;;  %v1339_v63 = vsub.f32 %v1287_v44, %v2311_v17 }
 0x17d   :  { %1129 = vmatpush.msra.mxu0 %v1089_v32  ;;  %1231 = vmatpush.msrb.mxu3 %v1043_v24  ;;  %v1346_v15 = vand.u32 4294901760, %v1345_v9 }
 0x17e   :  { %1200 = vmatpush.msrb.mxu2 %v1090_v35  ;;  %v1340_v8 = vand.u32 4294901760, %v1339_v63 }
 0x17f   :  { %1132 = vmatpush.msra.mxu0 %v1095_v25  ;;  %1233 = vmatpush.msrb.mxu3 %v1045_v33  ;;  %v1347_v28 = vsub.f32 %v1345_v9, %v1346_v15 }
 0x180   :  { %981 = vmatmul.f32.vlgmr.msrb.gmra.mxu0 %v822_v19  ;;  %1014 = vmatmul.f32.gmra.mxu1 %v2274_v42  ;;  %v1341_v5 = vsub.f32 %v1339_v63, %v1340_v8  ;;  %v1358_v19 = vand.u32 4294901760, %v1357_v23 }
 0x181   :  { %1302 = vmatpush.msrb.mxu0 %v2311_v17  ;;  %1204 = vmatpush.msrb.mxu2 %v1096_v38  ;;  %v1348_v29 = vand.u32 4294901760, %v1347_v28 }
 0x182   :  { %v1342_v22 = vand.u32 4294901760, %v1341_v5  ;;  %v1359_v32 = vsub.f32 %v1357_v23, %v1358_v19 }
 0x183   :  { %1304 = vmatpush.msrb.mxu0 %v1303_v0 }
 0x184   :  { %1343 = vmatpush.msrb.mxu1 %v1342_v22  ;;  %v1360_v34 = vand.u32 4294901760, %v1359_v32 }
 0x186   :  { %1349 = vmatpush.msrb.mxu1 %v1348_v29 }
 0x188   :  { %985 = vmatmul.f32.gmra.mxu0 %v2274_v42 }
 0x18c   :  { %v745_v42 = vpop.permute.xlu2 %744 }
 0x18e   :  { %v735_v48 = vpop.permute.xlu1 %734 }
 0x18f   :  { %v727_v46 = vpop.permute.xlu0 %726 }
 0x190   :  { %v732_v47 = vmax.f32 %v2186_v20, %v727_v46 }
 0x192   :  { %v740_v49 = vmax.f32 %v732_v47, %v735_v48 }
 0x194   :  { %v748_v52 = vmax.f32 %v740_v49, %v743_v51 }
 0x196   :  { %v1019_v27 = vsel %vm791_vm1, %v748_v52, 0 }
 0x197   :  { %v2318_v53 = vand.u32 4294901760, %v1019_v27 }
 0x199   :  { %1101 = vmatmul.f32.vlgmr.msra.gmra.mxu3 %v2318_v53  ;;  %v1048_v55 = vsub.f32 %v1019_v27, %v2318_v53 }
 0x19a   :  { %1419 = vmatpush.msra.mxu3 %v2311_v17 }
 0x19b   :  { %1135 = vmatmul.f32.vlgmr.msra.gmra.mxu0 %v1048_v55  ;;  %v1049_v56 = vand.u32 4294901760, %v1048_v55 }
 0x19c   :  { %1421 = vmatpush.msra.mxu3 %v1303_v0 }
 0x19d   :  { %1167 = vmatmul.f32.vlgmr.msra.gmra.mxu1 %v1049_v56  ;;  %v1050_v57 = vsub.f32 %v1048_v55, %v1049_v56 }
 0x19f   :  { %v1051_v58 = vand.u32 4294901760, %v1050_v57 }
 0x1a1   :  { %1052 = vmatmul.f32.vlgmr.msra.gmra.mxu2 %v1051_v58 }
 0x1a2   :  { %1385 = vmatpush.msra.mxu2 %v1339_v63 }
 0x1a4   :  { %v737_v43 = vpop.permute.xlu1 %736  ;;  %1388 = vmatpush.msra.mxu2 %v1345_v9 }
 0x1a5   :  { %v729_v20 = vpop.permute.xlu0 %728 }
 0x1a6   :  { %v733_v14 = vmax.f32 %v2205_v40, %v729_v20  ;;  %v1305_v40 = vand.u32 4294901760, %v1587_v6 }
 0x1a8   :  { %v741_v59 = vmax.f32 %v733_v14, %v737_v43  ;;  %v1351_v62 = vsub.f32 %v1587_v6, %v1305_v40  ;;  %1423 = vmatpush.msra.mxu3 %v1305_v40  ;;  %1306 = vmatpush.msrb.mxu0 %v1305_v40 }
 0x1aa   :  { %v749_v61 = vmax.f32 %v741_v59, %v745_v42  ;;  %v1352_v13 = vand.u32 4294901760, %v1351_v62  ;;  %1391 = vmatpush.msra.mxu2 %v1351_v62  ;;  %1425 = vmatpush.msra.mxu3 %v1307_v7 }
 0x1ab   :  { %1308 = vmatpush.msrb.mxu0 %v1307_v7 }
 0x1ac   :  { %v1022_v50 = vsel %vm791_vm1, %v749_v61, 0  ;;  %v1353_v16 = vsub.f32 %v1351_v62, %v1352_v13  ;;  %1394 = vmatpush.msra.mxu2 %v1357_v23 }
 0x1ad   :  { %v1055_v10 = vand.u32 4294901760, %v1022_v50  ;;  %1454 = vmatpush.msra.mxu0 %v1340_v8 }
 0x1ae   :  { %v1354_v31 = vand.u32 4294901760, %v1353_v16 }
 0x1af   :  { %1105 = vmatmul.f32.gmra.mxu3 %v1055_v10  ;;  %v1056_v18 = vsub.f32 %v1022_v50, %v1055_v10  ;;  %1458 = vmatpush.msra.mxu0 %v1346_v15 }
 0x1b0   :  { %1355 = vmatpush.msrb.mxu1 %v1354_v31 }
 0x1b1   :  { %1140 = vmatmul.f32.gmra.mxu0 %v1056_v18  ;;  %v1057_v24 = vand.u32 4294901760, %v1056_v18 }
 0x1b2   :  { %1361 = vmatpush.msrb.mxu1 %v1360_v34  ;;  %1462 = vmatpush.msra.mxu0 %v1352_v13 }
 0x1b3   :  { %1173 = vmatmul.f32.gmra.mxu1 %v1057_v24  ;;  %v1058_v30 = vsub.f32 %v1056_v18, %v1057_v24 }
 0x1b4   :  { %1489 = vmatpush.msra.mxu1 %v2311_v17  ;;  %1466 = vmatpush.msra.mxu0 %v1358_v19 }
 0x1b5   :  { %v1059_v33 = vand.u32 4294901760, %v1058_v30 }
 0x1b6   :  { %1491 = vmatpush.msra.mxu1 %v1303_v0  ;;  %v1268_v1 = vpop.permute.xlu2 %1267 }
 0x1b7   :  { %1060 = vmatmul.f32.gmra.mxu2 %v1059_v33  ;;  %1235 = vmatmul.f32.vlgmr.msrb.gmra.mxu3 %v2318_v53 }
 0x1b8   :  { %1493 = vmatpush.msra.mxu1 %v1305_v40 }
 0x1ba   :  { %1495 = vmatpush.msra.mxu1 %v1307_v7 }
 0x1bf   :  { %1206 = vmatmul.f32.vlgmr.msrb.gmra.mxu2 %v2318_v53  ;;  %1239 = vmatmul.f32.gmra.mxu3 %v1055_v10 }
 0x1c6   :  { %v1270_v17 = vpop.permute.xlu2 %1269 }
 0x1c7   :  { %1210 = vmatmul.f32.gmra.mxu2 %v1055_v10 }
 0x1ce   :  { %v1260_v35 = vpop.permute.xlu1 %1259 }
 0x1cf   :  { %v1252_v3 = vpop.permute.xlu0 %1251 }
 0x1d0   :  { %v1257_v54 = vmax.f32 %v2261_v26, %v1252_v3 }
 0x1d2   :  { %v1265_v25 = vmax.f32 %v1257_v54, %v1260_v35 }
 0x1d4   :  { %v1273_v2 = vmax.f32 %v1265_v25, %v1268_v1 }
 0x1d6   :  { %v1281_v37 = vsel %vm791_vm1, %v1273_v2, 0 }
 0x1d7   :  { %v1309_v38 = vand.u32 4294901760, %v1281_v37 }
 0x1d9   :  { %1363 = vmatmul.f32.vlgmr.msrb.gmra.mxu1 %v1309_v38  ;;  %v1310_v39 = vsub.f32 %v1281_v37, %v1309_v38 }
 0x1db   :  { %1397 = vmatmul.f32.vlgmr.msra.gmra.mxu2 %v1310_v39  ;;  %v1311_v41 = vand.u32 4294901760, %v1310_v39 }
 0x1dd   :  { %1429 = vmatmul.f32.vlgmr.msra.gmra.mxu3 %v1311_v41  ;;  %v1312_v45 = vsub.f32 %v1310_v39, %v1311_v41 }
 0x1df   :  { %v1254_v36 = vpop.permute.xlu0 %1253  ;;  %v1313_v4 = vand.u32 4294901760, %v1312_v45  ;;  %v1262_v44 = vpop.permute.xlu1 %1261 }
 0x1e0   :  { %v1258_v11 = vmax.f32 %v2289_v21, %v1254_v36 }
 0x1e1   :  { %1314 = vmatmul.f32.vlgmr.msrb.gmra.mxu0 %v1313_v4 }
 0x1e2   :  { %v1266_v26 = vmax.f32 %v1258_v11, %v1262_v44 }
 0x1e4   :  { %v1274_v46 = vmax.f32 %v1266_v26, %v1270_v17 }
 0x1e6   :  { %v1284_v47 = vsel %vm791_vm1, %v1274_v46, 0 }
 0x1e7   :  { %v1317_v48 = vand.u32 4294901760, %v1284_v47  ;;  %v881_v53 = vpop.f32.mrf.mxu3 }
 0x1e9   :  { %1367 = vmatmul.f32.gmra.mxu1 %v1317_v48  ;;  %v1318_v49 = vsub.f32 %v1284_v47, %v1317_v48 }
 0x1eb   :  { %1402 = vmatmul.f32.gmra.mxu2 %v1318_v49  ;;  %v1319_v51 = vand.u32 4294901760, %v1318_v49 }
 0x1ed   :  { %1435 = vmatmul.f32.gmra.mxu3 %v1319_v51  ;;  %v1320_v52 = vsub.f32 %v1318_v49, %v1319_v51  ;;  %v877_v55 = vpop.f32.mrf.mxu1 }
 0x1ef   :  { %v1321_v27 = vand.u32 4294901760, %v1320_v52  ;;  %v836_v21 = vpop.f32.mrf.mxu2 }
 0x1f0   :  { %v882_v62 = vadd.f32 %v881_v53, %v836_v21 }
 0x1f1   :  { %1322 = vmatmul.f32.gmra.mxu0 %v1321_v27  ;;  %1497 = vmatmul.f32.vlgmr.msra.gmra.mxu1 %v1309_v38 }
 0x1f5   :  { %v828_v56 = vpop.f32.mrf.mxu0  ;;  %v1011_v20 = vpop.f32.mrf.mxu1 }
 0x1f6   :  { %v878_v8 = vadd.f32 %v877_v55, %v828_v56 }
 0x1f7   :  { %v911_v57 = vpop.f32.mrf.mxu2  ;;  %v943_v58 = vpop.f32.mrf.mxu3 }
 0x1f8   :  { %v912_v40 = vadd.f32 %v911_v57, %v878_v8 }
 0x1f9   :  { %1468 = vmatmul.f32.vlgmr.msra.gmra.mxu0 %v1309_v38  ;;  %1501 = vmatmul.f32.gmra.mxu1 %v1317_v48 }
 0x1fa   :  { %v944_v15 = vadd.f32 %v943_v58, %v912_v40 }
 0x1fd   :  { %v982_v14 = vpop.f32.mrf.mxu0  ;;  %v1015_v42 = vpop.f32.mrf.mxu1 }
 0x1fe   :  { %v983_v7 = vadd.f32 %v982_v14, %v944_v15 }
 0x1ff   :  { %v916_v43 = vpop.f32.mrf.mxu2  ;;  %v949_v59 = vpop.f32.mrf.mxu3 }
 0x200   :  { %v917_v22 = vadd.f32 %v916_v43, %v882_v62  ;;  %v1012_v13 = vadd.f32 %v1011_v20, %v983_v7 }
 0x201   :  { %1472 = vmatmul.f32.gmra.mxu0 %v1317_v48 }
 0x202   :  { %v950_v24 = vadd.f32 %v949_v59, %v917_v22 }
 0x205   :  { %v986_v61 = vpop.f32.mrf.mxu0 }
 0x206   :  { %v987_v19 = vadd.f32 %v986_v61, %v950_v24 }
 0x208   :  { %v1016_v33 = vadd.f32 %v1015_v42, %v987_v19 }
 0x218   :  { %v1136_v50 = vpop.f32.mrf.mxu0 }
 0x21a   :  { %v1168_v0 = vpop.f32.mrf.mxu1 }
 0x21c   :  { %v1102_v63 = vpop.f32.mrf.mxu3 }
 0x224   :  { %v1053_v60 = vpop.f32.mrf.mxu2 }
 0x225   :  { %v1054_v29 = vadd.f32 %v1053_v60, %v1012_v13 }
 0x227   :  { %v1103_v30 = vadd.f32 %v1102_v63, %v1054_v29 }
 0x229   :  { %v1137_v35 = vadd.f32 %v1136_v50, %v1103_v30 }
 0x22b   :  { %v1169_v37 = vadd.f32 %v1168_v0, %v1137_v35 }
 0x22e   :  { %v1141_v12 = vpop.f32.mrf.mxu0 }
 0x230   :  { %v1174_v10 = vpop.f32.mrf.mxu1 }
 0x232   :  { %v1106_v9 = vpop.f32.mrf.mxu3 }
 0x23a   :  { %v1061_v6 = vpop.f32.mrf.mxu2  ;;  %v1236_v18 = vpop.f32.mrf.mxu3 }
 0x23b   :  { %v1062_v54 = vadd.f32 %v1061_v6, %v1016_v33 }
 0x23d   :  { %v1107_v2 = vadd.f32 %v1106_v9, %v1062_v54 }
 0x23f   :  { %v1142_v11 = vadd.f32 %v1141_v12, %v1107_v2 }
 0x241   :  { %v1175_v48 = vadd.f32 %v1174_v10, %v1142_v11 }
 0x242   :  { %v1207_v5 = vpop.f32.mrf.mxu2  ;;  %v1240_v31 = vpop.f32.mrf.mxu3 }
 0x243   :  { %v1208_v39 = vadd.f32 %v1207_v5, %v1169_v37 }
 0x245   :  { %v1237_v17 = vadd.f32 %v1236_v18, %v1208_v39 }
 0x24a   :  { %v1211_v16 = vpop.f32.mrf.mxu2 }
 0x24b   :  { %v1212_v52 = vadd.f32 %v1211_v16, %v1175_v48 }
 0x24d   :  { %v1241_v56 = vadd.f32 %v1240_v31, %v1212_v52 }
 0x256   :  { %v1364_v28 = vpop.f32.mrf.mxu1 }
 0x25e   :  { %v1315_v23 = vpop.f32.mrf.mxu0  ;;  %v1398_v25 = vpop.f32.mrf.mxu2 }
 0x25f   :  { %v1365_v34 = vadd.f32 %v1364_v28, %v1315_v23 }
 0x260   :  { %v1430_v38 = vpop.f32.mrf.mxu3 }
 0x261   :  { %v1399_v1 = vadd.f32 %v1398_v25, %v1365_v34 }
 0x263   :  { %v1431_v41 = vadd.f32 %v1430_v38, %v1399_v1 }
 0x266   :  { %v1368_v32 = vpop.f32.mrf.mxu1 }
 0x26e   :  { %v1323_v3 = vpop.f32.mrf.mxu0  ;;  %v1498_v36 = vpop.f32.mrf.mxu1 }
 0x26f   :  { %v1369_v45 = vadd.f32 %v1368_v32, %v1323_v3  ;;  %v1403_v26 = vpop.f32.mrf.mxu2 }
 0x270   :  { %v1436_v51 = vpop.f32.mrf.mxu3 }
 0x271   :  { %v1404_v46 = vadd.f32 %v1403_v26, %v1369_v45 }
 0x273   :  { %v1437_v27 = vadd.f32 %v1436_v51, %v1404_v46 }
 0x276   :  { %v1469_v4 = vpop.f32.mrf.mxu0  ;;  %v1502_v55 = vpop.f32.mrf.mxu1 }
 0x277   :  { %v1470_v44 = vadd.f32 %v1469_v4, %v1431_v41 }
 0x279   :  { %v1499_v47 = vadd.f32 %v1498_v36, %v1470_v44 }
 0x27b   :  { %v1505_v49 = vadd.f32 %v1499_v47, %v1237_v17 }
 0x27d   :  { %1508 = vst.msk [vmem:[%s2354_s6] sm:$0xff] %vm1507_vm2, %v1505_v49 }
 0x27e   :  { %v1473_v21 = vpop.f32.mrf.mxu0 }
 0x27f   :  { %v1474_v53 = vadd.f32 %v1473_v21, %v1437_v27 }
 0x281   :  { %v1503_v57 = vadd.f32 %v1502_v55, %v1474_v53 }
 0x283   :  { %v1506_v58 = vadd.f32 %v1503_v57, %v1241_v56 }
 0x285   :  { %1509 = vst.msk [vmem:[%s2354_s6 + $0x8] sm:$0xff] %vm1507_vm2, %v1506_v58 }
 0x286   :  { %1514 = vsyncpa [#allocation3], 1 }
 0x287   :  { %1515 = vsyncpa [#allocation5], 1 }
 0x288   :  { %1516 = vsyncpa [#allocation8], 1 }

</bundles_post_ra>
